<compile_context>
chip_gen: v5e
topology: v5e:2x2
jax: 0.10.0
libtpu: 0.0.40
codegen_flags: <defaults>
</compile_context>

<pallas_src>
import functools

import jax
import jax.numpy as jnp
from jax.experimental import pallas as pl
from jax.experimental.pallas import tpu as pltpu


def _round_up(x, m):
    return (x + m - 1) // m * m


def _vmem_limit_bytes():
    """Per-chip scoped-VMEM limit (v5e/v6e: 128 MiB phys, v7x: 64 MiB)."""
    cap = 64 * 1024 * 1024
    try:
        info = pltpu.get_tpu_info()
        cap = int(getattr(info, "vmem_capacity_bytes", cap))
    except Exception:
        pass
    return max(32 * 1024 * 1024, min(int(cap * 0.8), 100 * 1024 * 1024))


# ----------------------------------------------------------------------------
# Fused single-call kernel: grid = (phase, image).
#   phase 0: per-image conv (4-tap 2x2/s1 matmuls on the space-to-depth input)
#            -> bf16 VMEM scratch + f32 sum / sum-of-squares accumulators.
#   phase 1: fold batch-norm into scale/shift once, then FMA + LeakyReLU and
#            write the (Ho*Wo, Cp) output block.  The intermediate never
#            leaves VMEM.
# ----------------------------------------------------------------------------
def _fused_kernel(xs_ref, w_ref, gb_ref, o_ref, y_scr, stat_scr, ss_scr,
                  *, alpha, eps, count, ho, wo):
    p = pl.program_id(0)          # 0: conv + stats, 1: normalise + activation
    n = pl.program_id(1)          # image index
    cp = o_ref.shape[-1]

    @pl.when(p == 0)
    def _():
        @pl.when(n == 0)
        def _():
            stat_scr[...] = jnp.zeros_like(stat_scr)

        acc = jnp.zeros((ho * wo, cp), jnp.float32)
        for dh in range(2):                      # static 2x2 tap loop
            for dw in range(2):
                x_tap = xs_ref[dh:dh + ho, dw:dw + wo, :]
                x_tap = x_tap.reshape(ho * wo, x_tap.shape[-1])
                acc = acc + jnp.dot(x_tap, w_ref[dh, dw],
                                    preferred_element_type=jnp.float32)
        y_scr[n] = acc.astype(y_scr.dtype)       # bf16 resident intermediate

        # single-traversal partial stats (8-sublane partials, f32)
        y3 = acc.reshape(-1, 8, cp)
        stat_scr[0] += jnp.sum(y3, axis=0)
        stat_scr[1] += jnp.sum(y3 * y3, axis=0)

    @pl.when(p == 1)
    def _():
        @pl.when(n == 0)
        def _():
            mean = jnp.sum(stat_scr[0], axis=0, keepdims=True) / count
            ex2 = jnp.sum(stat_scr[1], axis=0, keepdims=True) / count
            var = jnp.maximum(ex2 - mean * mean, 0.0)
            scale = gb_ref[0:1, :] * jax.lax.rsqrt(var + eps)
            ss_scr[0:1, :] = scale
            ss_scr[1:2, :] = gb_ref[1:2, :] - mean * scale

        z = y_scr[n].astype(jnp.float32) * ss_scr[0:1, :] + ss_scr[1:2, :]
        o_ref[...] = jnp.where(z >= 0, z, alpha * z)


def _fused_vmem_bytes(n, ho, wo, cin, cp):
    c4 = 4 * cin
    y_scr = n * ho * wo * cp * 2                 # bf16 resident conv
    xs_blk = 2 * (ho + 1) * (wo + 1) * c4 * 2    # double-buffered input block
    w_blk = 2 * 4 * c4 * cp * 2                  # (resident) weight block
    out_blk = 2 * ho * wo * cp * 4               # f32 output block
    stats = (2 * 8 * cp + 2 * cp) * 4
    return y_scr + xs_blk + w_blk + out_blk + stats


def _dblock_fused(x_nchw, weight, gamma, beta, *, alpha, eps, vmem_limit):
    N, Cin, H, W = x_nchw.shape
    Cout = weight.shape[0]
    Ho, Wo = H // 2, W // 2
    C4 = 4 * Cin
    Cp = _round_up(Cout, 128)     # lane-dense channels (v5e-native; see notes)
    M = N * Ho * Wo

    # ---- XLA glue: pad + space-to-depth (k4/s2/p1 conv == 2x2/s1 conv on xs)
    x_nhwc = jnp.transpose(x_nchw, (0, 2, 3, 1)).astype(jnp.bfloat16)
    xp = jnp.pad(x_nhwc, ((0, 0), (1, 1), (1, 1), (0, 0)))
    xs = xp.reshape(N, Ho + 1, 2, Wo + 1, 2, Cin)
    xs = jnp.transpose(xs, (0, 1, 3, 2, 4, 5)).reshape(N, Ho + 1, Wo + 1, C4)

    # weight (Cout,Cin,4,4) -> W2[dh, dw, (dy,dx,ci), co], co padded to Cp
    w2 = weight.reshape(Cout, Cin, 2, 2, 2, 2)          # co,ci,dh,dy,dw,dx
    w2 = jnp.transpose(w2, (2, 4, 3, 5, 1, 0)).reshape(2, 2, C4, Cout)
    w2 = jnp.pad(w2, ((0, 0), (0, 0), (0, 0), (0, Cp - Cout))).astype(jnp.bfloat16)

    # gamma/beta zero-padded (keeps padded channels exactly zero)
    gb = jnp.stack([jnp.pad(gamma.astype(jnp.float32), (0, Cp - Cout)),
                    jnp.pad(beta.astype(jnp.float32), (0, Cp - Cout))], axis=0)

    kernel = functools.partial(_fused_kernel, alpha=alpha, eps=eps,
                               count=float(M), ho=Ho, wo=Wo)

    out_flat = pl.pallas_call(
        kernel,
        out_shape=jax.ShapeDtypeStruct((M, Cp), jnp.float32),
        grid_spec=pltpu.PrefetchScalarGridSpec(
            num_scalar_prefetch=0,
            grid=(2, N),
            in_specs=[
                # whole padded+s2d image; only fetched during phase 0
                pl.BlockSpec((pl.Squeezed(), Ho + 1, Wo + 1, C4),
                             lambda p, n: (n * (1 - p), 0, 0, 0)),
                pl.BlockSpec((2, 2, C4, Cp), lambda p, n: (0, 0, 0, 0)),
                pl.BlockSpec((2, Cp), lambda p, n: (0, 0)),
            ],
            # phase 0 never writes; all phase-0 steps map to block 0 so no
            # spurious write-backs happen before phase 1 overwrites it.
            out_specs=pl.BlockSpec((Ho * Wo, Cp), lambda p, n: (n * p, 0)),
            scratch_shapes=[
                pltpu.VMEM((N, Ho * Wo, Cp), jnp.bfloat16),   # conv resident
                pltpu.VMEM((2, 8, Cp), jnp.float32),          # sum / sum-sq
                pltpu.VMEM((2, Cp), jnp.float32),             # scale / shift
            ],
        ),
        compiler_params=pltpu.CompilerParams(
            dimension_semantics=("arbitrary", "arbitrary"),
            vmem_limit_bytes=vmem_limit),
    )(xs, w2, gb)

    return out_flat[:, :Cout].reshape(N, Ho, Wo, Cout)


# ----------------------------------------------------------------------------
# Two-pass fallback (general k/s/p or layers too big for the fused path).
# Pass A: im2col matmul (bf16 MXU, f32 acc) -> bf16 intermediate + per-tile
#         partial stats (fully "parallel" grid).
# Pass B: folded BN scale/shift + LeakyReLU, aliased in-place on the bf16
#         intermediate.
# ----------------------------------------------------------------------------
def _conv_stats_kernel(p_ref, w_ref, y_ref, sum_ref, ssq_ref):
    y = jnp.dot(p_ref[...], w_ref[...], preferred_element_type=jnp.float32)
    y_ref[...] = y.astype(y_ref.dtype)           # bf16 intermediate to HBM
    y3 = y.reshape(-1, 8, y.shape[-1])           # stats from the f32 value
    sum_ref[...] = jnp.sum(y3, axis=0)[None]
    ssq_ref[...] = jnp.sum(y3 * y3, axis=0)[None]


def _bn_lrelu_kernel(y_ref, ss_ref, o_ref, *, alpha):
    z = y_ref[...].astype(jnp.float32) * ss_ref[0:1, :] + ss_ref[1:2, :]
    o_ref[...] = jnp.where(z >= 0, z, alpha * z).astype(o_ref.dtype)


def _dblock_two_pass(x_nchw, weight, gamma, beta, *, stride, padding, alpha,
                     eps, tm, vmem_limit):
    N, Cin, H, W = x_nchw.shape
    Cout, _, K, _ = weight.shape
    Ho = (H + 2 * padding - K) // stride + 1
    Wo = (W + 2 * padding - K) // stride + 1
    M = N * Ho * Wo
    Kdim = K * K * Cin
    Kp = _round_up(Kdim, 128)     # lane-dense contraction
    Cp = _round_up(Cout, 128)     # lane-dense channels

    tm_eff = min(_round_up(tm, 16), _round_up(M, 16))
    n_tiles = pl.cdiv(M, tm_eff)
    if n_tiles > 1 and n_tiles % 2:      # even split for the two v7x TCs
        n_tiles += 1
    M_pad = n_tiles * tm_eff

    # im2col in bf16 (XLA glue).
    # TODO(synk): fuse im2col into pass A (per-tap in-kernel slicing, as done
    # in the fused path) for layers that fall through to this path.
    x_nhwc = jnp.transpose(x_nchw, (0, 2, 3, 1)).astype(jnp.bfloat16)
    x_pad = jnp.pad(x_nhwc, ((0, 0), (padding, padding),
                             (padding, padding), (0, 0)))
    cols = []
    for kh in range(K):
        for kw in range(K):
            cols.append(x_pad[:, kh:kh + stride * Ho:stride,
                              kw:kw + stride * Wo:stride, :])
    patches = jnp.stack(cols, axis=3).reshape(M, Kdim)
    patches = jnp.pad(patches, ((0, M_pad - M), (0, Kp - Kdim)))

    w_flat = jnp.transpose(weight, (2, 3, 1, 0)).reshape(Kdim, Cout)
    w_flat = jnp.pad(w_flat, ((0, Kp - Kdim), (0, Cp - Cout))).astype(jnp.bfloat16)

    cparams = pltpu.CompilerParams(dimension_semantics=("parallel",),
                                   vmem_limit_bytes=vmem_limit)

    conv, psum, pssq = pl.pallas_call(
        _conv_stats_kernel,
        out_shape=(jax.ShapeDtypeStruct((M_pad, Cp), jnp.bfloat16),
                   jax.ShapeDtypeStruct((n_tiles, 8, Cp), jnp.float32),
                   jax.ShapeDtypeStruct((n_tiles, 8, Cp), jnp.float32)),
        grid_spec=pltpu.PrefetchScalarGridSpec(
            num_scalar_prefetch=0,
            grid=(n_tiles,),
            in_specs=[
                pl.BlockSpec((tm_eff, Kp), lambda i: (i, 0)),
                # TODO(synk): single-buffer / K-split this constant block on
                # v7x when Kp*Cp gets large (>= 8 MiB).
                pl.BlockSpec((Kp, Cp), lambda i: (0, 0)),
            ],
            out_specs=[
                pl.BlockSpec((tm_eff, Cp), lambda i: (i, 0)),
                pl.BlockSpec((1, 8, Cp), lambda i: (i, 0, 0)),
                pl.BlockSpec((1, 8, Cp), lambda i: (i, 0, 0)),
            ],
        ),
        compiler_params=cparams,
    )(patches, w_flat)

    # Training-mode batch statistics (biased variance over N*Ho*Wo).
    count = jnp.float32(M)
    mean = jnp.sum(psum, axis=(0, 1)) / count
    var = jnp.maximum(jnp.sum(pssq, axis=(0, 1)) / count - mean * mean, 0.0)
    gamma_p = jnp.pad(gamma.astype(jnp.float32), (0, Cp - Cout))
    beta_p = jnp.pad(beta.astype(jnp.float32), (0, Cp - Cout))
    scale = gamma_p * jax.lax.rsqrt(var + eps)
    shift = beta_p - mean * scale
    ss = jnp.stack([scale, shift], axis=0)              # (2, Cp)

    out_flat = pl.pallas_call(
        functools.partial(_bn_lrelu_kernel, alpha=alpha),
        out_shape=jax.ShapeDtypeStruct((M_pad, Cp), jnp.bfloat16),
        grid_spec=pltpu.PrefetchScalarGridSpec(
            num_scalar_prefetch=0,
            grid=(n_tiles,),
            in_specs=[pl.BlockSpec((tm_eff, Cp), lambda i: (i, 0)),
                      pl.BlockSpec((2, Cp), lambda i: (0, 0))],
            out_specs=pl.BlockSpec((tm_eff, Cp), lambda i: (i, 0)),
        ),
        input_output_aliases={0: 0},                    # in-place on bf16 buf
        compiler_params=cparams,
    )(conv, ss)

    return out_flat[:M, :Cout].astype(jnp.float32).reshape(N, Ho, Wo, Cout)


# ----------------------------------------------------------------------------
# Public forward (PyTorch-compatible NCHW in / NCHW out by default).
# ----------------------------------------------------------------------------
def dblock_forward(x_nchw, weight, gamma, beta, *, stride=2, padding=1,
                   alpha=0.2, eps=1e-5, tm=512, nchw_output=True,
                   force_two_pass=False):
    N, Cin, H, W = x_nchw.shape
    Cout, Cin_w, K, K2 = weight.shape
    assert Cin == Cin_w and K == K2

    Ho = (H + 2 * padding - K) // stride + 1
    Wo = (W + 2 * padding - K) // stride + 1
    Cp = _round_up(Cout, 128)
    vmem_limit = _vmem_limit_bytes()

    out_nhwc = None
    can_fuse = (not force_two_pass
                and K == 4 and stride == 2 and padding == 1
                and H % 2 == 0 and W % 2 == 0 and Wo % 8 == 0
                and _fused_vmem_bytes(N, Ho, Wo, Cin, Cp) <= vmem_limit // 2)
    if can_fuse:
        try:
            out_nhwc = _dblock_fused(x_nchw, weight, gamma, beta,
                                     alpha=alpha, eps=eps,
                                     vmem_limit=vmem_limit)
        except Exception:
            out_nhwc = None      # defensive: fall back to the two-pass path
    if out_nhwc is None:
        out_nhwc = _dblock_two_pass(x_nchw, weight, gamma, beta,
                                    stride=stride, padding=padding,
                                    alpha=alpha, eps=eps, tm=tm,
                                    vmem_limit=vmem_limit)
    if nchw_output:
        return jnp.transpose(out_nhwc, (0, 3, 1, 2))
    return out_nhwc


# ----------------------------------------------------------------------------
# Pure-JAX reference for the sanity check
# ----------------------------------------------------------------------------
def dblock_reference(x, w, gamma, beta, *, alpha=0.2, eps=1e-5):
    y = jax.lax.conv_general_dilated(
        x, w, window_strides=(2, 2), padding=((1, 1), (1, 1)),
        dimension_numbers=("NCHW", "OIHW", "NCHW"),
        precision=jax.lax.Precision.HIGHEST)
    mean = y.mean(axis=(0, 2, 3), keepdims=True)
    var = y.var(axis=(0, 2, 3), keepdims=True)
    z = (y - mean) / jnp.sqrt(var + eps) * gamma.reshape(1, -1, 1, 1) \
        + beta.reshape(1, -1, 1, 1)
    return jnp.where(z >= 0, z, alpha * z)


if __name__ == "__main__":
    key = jax.random.PRNGKey(0)
    k_x, k_w = jax.random.split(key)

    N, Cin, H, W = 2, 3, 16, 16
    Cout, K = 8, 4

    x = jax.random.normal(k_x, (N, Cin, H, W), dtype=jnp.float32)
    weight = 0.05 * jax.random.normal(k_w, (Cout, Cin, K, K), dtype=jnp.float32)
    gamma = jnp.ones((Cout,), jnp.float32)    # BatchNorm2d default affine init
    beta = jnp.zeros((Cout,), jnp.float32)

    ref = dblock_reference(x, weight, gamma, beta)

    # fused single-call path (default dispatch for this layer shape)
    out_fused = jax.block_until_ready(dblock_forward(x, weight, gamma, beta))
    assert out_fused.shape == (N, Cout, H // 2, W // 2), out_fused.shape
    assert bool(jnp.all(jnp.isfinite(out_fused)))
    assert bool(jnp.allclose(out_fused, ref, atol=1e-2, rtol=1e-2)), \
        float(jnp.max(jnp.abs(out_fused - ref)))

    # two-pass fallback path (exercised explicitly)
    out_2p = jax.block_until_ready(
        dblock_forward(x, weight, gamma, beta, force_two_pass=True))
    assert out_2p.shape == (N, Cout, H // 2, W // 2), out_2p.shape
    assert bool(jnp.all(jnp.isfinite(out_2p)))
    assert bool(jnp.allclose(out_2p, ref, atol=1e-2, rtol=1e-2)), \
        float(jnp.max(jnp.abs(out_2p - ref)))

    print("KERNEL_OK")
</pallas_src>

<mosaic_0001>
module attributes {stable_mosaic.version = 11 : i64} {
  func.func @_fused_kernel(%arg0: i32, %arg1: i32, %arg2: memref<1x9x9x12xbf16, #tpu.memory_space<vmem>>, %arg3: memref<2x2x12x128xbf16, #tpu.memory_space<vmem>>, %arg4: memref<2x128xf32, #tpu.memory_space<vmem>>, %arg5: memref<64x128xf32, #tpu.memory_space<vmem>>, %arg6: memref<2x64x128xbf16, #tpu.memory_space<vmem>>, %arg7: memref<2x8x128xf32, #tpu.memory_space<vmem>>, %arg8: memref<2x128xf32, #tpu.memory_space<vmem>>) attributes {dimension_semantics = [#tpu.dimension_semantics<arbitrary>, #tpu.dimension_semantics<arbitrary>], iteration_bounds = array<i64: 2, 2>, scalar_prefetch = 0 : i64, scratch_operands = 3 : i64, tpu.core_type = #tpu.core_type<tc>, window_params = [{transform_indices = @transform_0, window_bounds = array<i64: 1, 9, 9, 12>}, {pipeline_mode = #tpu.pipeline_mode<synchronous>, transform_indices = @transform_1, window_bounds = array<i64: 2, 2, 12, 128>}, {pipeline_mode = #tpu.pipeline_mode<synchronous>, transform_indices = @transform_2, window_bounds = array<i64: 2, 128>}, {transform_indices = @transform_3, window_bounds = array<i64: 64, 128>}]} {
    %c0_i32 = arith.constant 0 : i32
    %0 = arith.cmpi eq, %arg0, %c0_i32 : i32
    %1 = arith.extui %0 : i1 to i32
    %c0_i32_0 = arith.constant 0 : i32
    %2 = arith.cmpi ne, %1, %c0_i32_0 : i32
    scf.if %2 {
      %c0_i32_2 = arith.constant 0 : i32
      %6 = arith.cmpi eq, %arg1, %c0_i32_2 : i32
      %7 = arith.extui %6 : i1 to i32
      %c0_i32_3 = arith.constant 0 : i32
      %8 = arith.cmpi ne, %7, %c0_i32_3 : i32
      scf.if %8 {
        %cst_54 = arith.constant 0.000000e+00 : f32
        %59 = vector.broadcast %cst_54 : f32 to vector<2x8x128xf32>
        %c0_55 = arith.constant 0 : index
        %c0_56 = arith.constant 0 : index
        %c0_57 = arith.constant 0 : index
        %60 = vector.load %arg7[%c0_55, %c0_56, %c0_57] : memref<2x8x128xf32, #tpu.memory_space<vmem>>, vector<2x8x128xf32>
        tpu.vector_store %arg7[%c0_55, %c0_56, %c0_57], %59 {strides = array<i32>} : memref<2x8x128xf32, #tpu.memory_space<vmem>>, vector<2x8x128xf32>,
      } else {
      }
      %cst = arith.constant 0.000000e+00 : f32
      %9 = vector.broadcast %cst : f32 to vector<64x128xf32>
      %c0 = arith.constant 0 : index
      %c0_4 = arith.constant 0 : index
      %c0_5 = arith.constant 0 : index
      %c0_6 = arith.constant 0 : index
      %10 = vector.load %arg2[%c0, %c0_4, %c0_5, %c0_6] : memref<1x9x9x12xbf16, #tpu.memory_space<vmem>>, vector<1x8x8x12xbf16>
      %11 = vector.shape_cast %10 : vector<1x8x8x12xbf16> to vector<8x8x12xbf16>
      %12 = vector.shape_cast %11 : vector<8x8x12xbf16> to vector<64x12xbf16>
      %c0_7 = arith.constant 0 : index
      %c0_8 = arith.constant 0 : index
      %c0_9 = arith.constant 0 : index
      %c0_10 = arith.constant 0 : index
      %13 = vector.load %arg3[%c0_7, %c0_8, %c0_9, %c0_10] : memref<2x2x12x128xbf16, #tpu.memory_space<vmem>>, vector<1x1x12x128xbf16>
      %14 = vector.shape_cast %13 : vector<1x1x12x128xbf16> to vector<12x128xbf16>
      %cst_11 = arith.constant dense<0.000000e+00> : vector<64x128xf32>
      %15 = tpu.matmul %12, %14, %cst_11 {dimension_numbers = #tpu.dot_dimension_numbers<[1], [0], [0], [1], [0, 0, 1, 1], [], []>} : vector<64x12xbf16>, vector<12x128xbf16>, vector<64x128xf32> -> vector<64x128xf32>
      %16 = arith.addf %9, %15 : vector<64x128xf32>
      %c0_12 = arith.constant 0 : index
      %c0_13 = arith.constant 0 : index
      %c1 = arith.constant 1 : index
      %c0_14 = arith.constant 0 : index
      %17 = vector.load %arg2[%c0_12, %c0_13, %c1, %c0_14] : memref<1x9x9x12xbf16, #tpu.memory_space<vmem>>, vector<1x8x8x12xbf16>
      %18 = vector.shape_cast %17 : vector<1x8x8x12xbf16> to vector<8x8x12xbf16>
      %19 = vector.shape_cast %18 : vector<8x8x12xbf16> to vector<64x12xbf16>
      %c0_15 = arith.constant 0 : index
      %c1_16 = arith.constant 1 : index
      %c0_17 = arith.constant 0 : index
      %c0_18 = arith.constant 0 : index
      %20 = vector.load %arg3[%c0_15, %c1_16, %c0_17, %c0_18] : memref<2x2x12x128xbf16, #tpu.memory_space<vmem>>, vector<1x1x12x128xbf16>
      %21 = vector.shape_cast %20 : vector<1x1x12x128xbf16> to vector<12x128xbf16>
      %cst_19 = arith.constant dense<0.000000e+00> : vector<64x128xf32>
      %22 = tpu.matmul %19, %21, %cst_19 {dimension_numbers = #tpu.dot_dimension_numbers<[1], [0], [0], [1], [0, 0, 1, 1], [], []>} : vector<64x12xbf16>, vector<12x128xbf16>, vector<64x128xf32> -> vector<64x128xf32>
      %23 = arith.addf %16, %22 : vector<64x128xf32>
      %c0_20 = arith.constant 0 : index
      %c1_21 = arith.constant 1 : index
      %c0_22 = arith.constant 0 : index
      %c0_23 = arith.constant 0 : index
      %24 = vector.load %arg2[%c0_20, %c1_21, %c0_22, %c0_23] : memref<1x9x9x12xbf16, #tpu.memory_space<vmem>>, vector<1x8x8x12xbf16>
      %25 = vector.shape_cast %24 : vector<1x8x8x12xbf16> to vector<8x8x12xbf16>
      %26 = vector.shape_cast %25 : vector<8x8x12xbf16> to vector<64x12xbf16>
      %c1_24 = arith.constant 1 : index
      %c0_25 = arith.constant 0 : index
      %c0_26 = arith.constant 0 : index
      %c0_27 = arith.constant 0 : index
      %27 = vector.load %arg3[%c1_24, %c0_25, %c0_26, %c0_27] : memref<2x2x12x128xbf16, #tpu.memory_space<vmem>>, vector<1x1x12x128xbf16>
      %28 = vector.shape_cast %27 : vector<1x1x12x128xbf16> to vector<12x128xbf16>
      %cst_28 = arith.constant dense<0.000000e+00> : vector<64x128xf32>
      %29 = tpu.matmul %26, %28, %cst_28 {dimension_numbers = #tpu.dot_dimension_numbers<[1], [0], [0], [1], [0, 0, 1, 1], [], []>} : vector<64x12xbf16>, vector<12x128xbf16>, vector<64x128xf32> -> vector<64x128xf32>
      %30 = arith.addf %23, %29 : vector<64x128xf32>
      %c0_29 = arith.constant 0 : index
      %c1_30 = arith.constant 1 : index
      %c1_31 = arith.constant 1 : index
      %c0_32 = arith.constant 0 : index
      %31 = vector.load %arg2[%c0_29, %c1_30, %c1_31, %c0_32] : memref<1x9x9x12xbf16, #tpu.memory_space<vmem>>, vector<1x8x8x12xbf16>
      %32 = vector.shape_cast %31 : vector<1x8x8x12xbf16> to vector<8x8x12xbf16>
      %33 = vector.shape_cast %32 : vector<8x8x12xbf16> to vector<64x12xbf16>
      %c1_33 = arith.constant 1 : index
      %c1_34 = arith.constant 1 : index
      %c0_35 = arith.constant 0 : index
      %c0_36 = arith.constant 0 : index
      %34 = vector.load %arg3[%c1_33, %c1_34, %c0_35, %c0_36] : memref<2x2x12x128xbf16, #tpu.memory_space<vmem>>, vector<1x1x12x128xbf16>
      %35 = vector.shape_cast %34 : vector<1x1x12x128xbf16> to vector<12x128xbf16>
      %cst_37 = arith.constant dense<0.000000e+00> : vector<64x128xf32>
      %36 = tpu.matmul %33, %35, %cst_37 {dimension_numbers = #tpu.dot_dimension_numbers<[1], [0], [0], [1], [0, 0, 1, 1], [], []>} : vector<64x12xbf16>, vector<12x128xbf16>, vector<64x128xf32> -> vector<64x128xf32>
      %37 = arith.addf %30, %36 : vector<64x128xf32>
      %38 = arith.truncf %37 : vector<64x128xf32> to vector<64x128xbf16>
      %39 = arith.index_cast %arg1 : i32 to index
      %c0_38 = arith.constant 0 : index
      %c0_39 = arith.constant 0 : index
      %40 = vector.load %arg6[%39, %c0_38, %c0_39] : memref<2x64x128xbf16, #tpu.memory_space<vmem>>, vector<1x64x128xbf16>
      %41 = vector.shape_cast %40 : vector<1x64x128xbf16> to vector<64x128xbf16>
      %42 = vector.shape_cast %38 : vector<64x128xbf16> to vector<1x64x128xbf16>
      tpu.vector_store %arg6[%39, %c0_38, %c0_39], %42 {strides = array<i32>} : memref<2x64x128xbf16, #tpu.memory_space<vmem>>, vector<1x64x128xbf16>,
      %43 = vector.shape_cast %37 : vector<64x128xf32> to vector<8x8x128xf32>
      %c0_40 = arith.constant 0 : index
      %c0_41 = arith.constant 0 : index
      %c0_42 = arith.constant 0 : index
      %44 = vector.load %arg7[%c0_40, %c0_41, %c0_42] : memref<2x8x128xf32, #tpu.memory_space<vmem>>, vector<1x8x128xf32>
      %45 = vector.shape_cast %44 : vector<1x8x128xf32> to vector<8x128xf32>
      %cst_43 = arith.constant dense<0.000000e+00> : vector<8x128xf32>
      %46 = vector.multi_reduction <add>, %43, %cst_43 [0] : vector<8x8x128xf32> to vector<8x128xf32>
      %47 = arith.addf %45, %46 : vector<8x128xf32>
      %c0_44 = arith.constant 0 : index
      %c0_45 = arith.constant 0 : index
      %c0_46 = arith.constant 0 : index
      %48 = vector.load %arg7[%c0_44, %c0_45, %c0_46] : memref<2x8x128xf32, #tpu.memory_space<vmem>>, vector<1x8x128xf32>
      %49 = vector.shape_cast %48 : vector<1x8x128xf32> to vector<8x128xf32>
      %50 = vector.shape_cast %47 : vector<8x128xf32> to vector<1x8x128xf32>
      tpu.vector_store %arg7[%c0_44, %c0_45, %c0_46], %50 {strides = array<i32>} : memref<2x8x128xf32, #tpu.memory_space<vmem>>, vector<1x8x128xf32>,
      %c1_47 = arith.constant 1 : index
      %c0_48 = arith.constant 0 : index
      %c0_49 = arith.constant 0 : index
      %51 = vector.load %arg7[%c1_47, %c0_48, %c0_49] : memref<2x8x128xf32, #tpu.memory_space<vmem>>, vector<1x8x128xf32>
      %52 = vector.shape_cast %51 : vector<1x8x128xf32> to vector<8x128xf32>
      %53 = arith.mulf %43, %43 : vector<8x8x128xf32>
      %cst_50 = arith.constant dense<0.000000e+00> : vector<8x128xf32>
      %54 = vector.multi_reduction <add>, %53, %cst_50 [0] : vector<8x8x128xf32> to vector<8x128xf32>
      %55 = arith.addf %52, %54 : vector<8x128xf32>
      %c1_51 = arith.constant 1 : index
      %c0_52 = arith.constant 0 : index
      %c0_53 = arith.constant 0 : index
      %56 = vector.load %arg7[%c1_51, %c0_52, %c0_53] : memref<2x8x128xf32, #tpu.memory_space<vmem>>, vector<1x8x128xf32>
      %57 = vector.shape_cast %56 : vector<1x8x128xf32> to vector<8x128xf32>
      %58 = vector.shape_cast %55 : vector<8x128xf32> to vector<1x8x128xf32>
      tpu.vector_store %arg7[%c1_51, %c0_52, %c0_53], %58 {strides = array<i32>} : memref<2x8x128xf32, #tpu.memory_space<vmem>>, vector<1x8x128xf32>,
    } else {
    }
    %c1_i32 = arith.constant 1 : i32
    %3 = arith.cmpi eq, %arg0, %c1_i32 : i32
    %4 = arith.extui %3 : i1 to i32
    %c0_i32_1 = arith.constant 0 : i32
    %5 = arith.cmpi ne, %4, %c0_i32_1 : i32
    scf.if %5 {
      %c0_i32_2 = arith.constant 0 : i32
      %6 = arith.cmpi eq, %arg1, %c0_i32_2 : i32
      %7 = arith.extui %6 : i1 to i32
      %c0_i32_3 = arith.constant 0 : i32
      %8 = arith.cmpi ne, %7, %c0_i32_3 : i32
      scf.if %8 {
        %c0_11 = arith.constant 0 : index
        %c0_12 = arith.constant 0 : index
        %c0_13 = arith.constant 0 : index
        %25 = vector.load %arg7[%c0_11, %c0_12, %c0_13] : memref<2x8x128xf32, #tpu.memory_space<vmem>>, vector<1x8x128xf32>
        %26 = vector.shape_cast %25 : vector<1x8x128xf32> to vector<8x128xf32>
        %cst_14 = arith.constant dense<0.000000e+00> : vector<128xf32>
        %27 = vector.multi_reduction <add>, %26, %cst_14 [0] : vector<8x128xf32> to vector<128xf32>
        %28 = vector.shape_cast %27 : vector<128xf32> to vector<1x128xf32>
        %cst_15 = arith.constant 1.280000e+02 : f32
        %29 = vector.broadcast %cst_15 : f32 to vector<1x128xf32>
        %30 = arith.divf %28, %29 : vector<1x128xf32>
        %c1_16 = arith.constant 1 : index
        %c0_17 = arith.constant 0 : index
        %c0_18 = arith.constant 0 : index
        %31 = vector.load %arg7[%c1_16, %c0_17, %c0_18] : memref<2x8x128xf32, #tpu.memory_space<vmem>>, vector<1x8x128xf32>
        %32 = vector.shape_cast %31 : vector<1x8x128xf32> to vector<8x128xf32>
        %cst_19 = arith.constant dense<0.000000e+00> : vector<128xf32>
        %33 = vector.multi_reduction <add>, %32, %cst_19 [0] : vector<8x128xf32> to vector<128xf32>
        %34 = vector.shape_cast %33 : vector<128xf32> to vector<1x128xf32>
        %cst_20 = arith.constant 1.280000e+02 : f32
        %35 = vector.broadcast %cst_20 : f32 to vector<1x128xf32>
        %36 = arith.divf %34, %35 : vector<1x128xf32>
        %37 = arith.mulf %30, %30 : vector<1x128xf32>
        %38 = arith.subf %36, %37 : vector<1x128xf32>
        %cst_21 = arith.constant 0.000000e+00 : f32
        %39 = vector.broadcast %cst_21 : f32 to vector<1x128xf32>
        %40 = arith.maximumf %38, %39 : vector<1x128xf32>
        %c0_22 = arith.constant 0 : index
        %c0_23 = arith.constant 0 : index
        %41 = vector.load %arg4[%c0_22, %c0_23] : memref<2x128xf32, #tpu.memory_space<vmem>>, vector<1x128xf32>
        %cst_24 = arith.constant 9.99999974E-6 : f32
        %42 = vector.broadcast %cst_24 : f32 to vector<1x128xf32>
        %43 = arith.addf %40, %42 : vector<1x128xf32>
        %44 = math.rsqrt %43 : vector<1x128xf32>
        %45 = arith.mulf %41, %44 : vector<1x128xf32>
        %c0_25 = arith.constant 0 : index
        %c0_26 = arith.constant 0 : index
        %46 = vector.load %arg8[%c0_25, %c0_26] : memref<2x128xf32, #tpu.memory_space<vmem>>, vector<1x128xf32>
        tpu.vector_store %arg8[%c0_25, %c0_26], %45 {strides = array<i32>} : memref<2x128xf32, #tpu.memory_space<vmem>>, vector<1x128xf32>,
        %c1_27 = arith.constant 1 : index
        %c0_28 = arith.constant 0 : index
        %47 = vector.load %arg4[%c1_27, %c0_28] : memref<2x128xf32, #tpu.memory_space<vmem>>, vector<1x128xf32>
        %48 = arith.mulf %30, %45 : vector<1x128xf32>
        %49 = arith.subf %47, %48 : vector<1x128xf32>
        %c1_29 = arith.constant 1 : index
        %c0_30 = arith.constant 0 : index
        %50 = vector.load %arg8[%c1_29, %c0_30] : memref<2x128xf32, #tpu.memory_space<vmem>>, vector<1x128xf32>
        tpu.vector_store %arg8[%c1_29, %c0_30], %49 {strides = array<i32>} : memref<2x128xf32, #tpu.memory_space<vmem>>, vector<1x128xf32>,
      } else {
      }
      %9 = arith.index_cast %arg1 : i32 to index
      %c0 = arith.constant 0 : index
      %c0_4 = arith.constant 0 : index
      %10 = vector.load %arg6[%9, %c0, %c0_4] : memref<2x64x128xbf16, #tpu.memory_space<vmem>>, vector<1x64x128xbf16>
      %11 = vector.shape_cast %10 : vector<1x64x128xbf16> to vector<64x128xbf16>
      %12 = arith.extf %11 : vector<64x128xbf16> to vector<64x128xf32>
      %c0_5 = arith.constant 0 : index
      %c0_6 = arith.constant 0 : index
      %13 = vector.load %arg8[%c0_5, %c0_6] : memref<2x128xf32, #tpu.memory_space<vmem>>, vector<1x128xf32>
      %14 = vector.broadcast %13 : vector<1x128xf32> to vector<64x128xf32>
      %15 = arith.mulf %12, %14 : vector<64x128xf32>
      %c1 = arith.constant 1 : index
      %c0_7 = arith.constant 0 : index
      %16 = vector.load %arg8[%c1, %c0_7] : memref<2x128xf32, #tpu.memory_space<vmem>>, vector<1x128xf32>
      %17 = vector.broadcast %16 : vector<1x128xf32> to vector<64x128xf32>
      %18 = arith.addf %15, %17 : vector<64x128xf32>
      %cst = arith.constant 0.000000e+00 : f32
      %19 = vector.broadcast %cst : f32 to vector<64x128xf32>
      %20 = arith.cmpf oge, %18, %19 : vector<64x128xf32>
      %cst_8 = arith.constant 2.000000e-01 : f32
      %21 = vector.broadcast %cst_8 : f32 to vector<64x128xf32>
      %22 = arith.mulf %21, %18 : vector<64x128xf32>
      %23 = arith.select %20, %18, %22 : vector<64x128xi1>, vector<64x128xf32>
      %c0_9 = arith.constant 0 : index
      %c0_10 = arith.constant 0 : index
      %24 = vector.load %arg5[%c0_9, %c0_10] : memref<64x128xf32, #tpu.memory_space<vmem>>, vector<64x128xf32>
      tpu.vector_store %arg5[%c0_9, %c0_10], %23 {strides = array<i32>} : memref<64x128xf32, #tpu.memory_space<vmem>>, vector<64x128xf32>,
    } else {
    }
    return
  }
  func.func @transform_0(%arg0: i32, %arg1: i32) -> (i32, i32, i32, i32) {
    %c1_i32 = arith.constant 1 : i32
    %0 = arith.subi %c1_i32, %arg0 : i32
    %1 = arith.muli %arg1, %0 : i32
    %c0_i32 = arith.constant 0 : i32
    %c0_i32_0 = arith.constant 0 : i32
    %c0_i32_1 = arith.constant 0 : i32
    %c0_i32_2 = arith.constant 0 : i32
    return %1, %c0_i32, %c0_i32_0, %c0_i32_1 : i32, i32, i32, i32
  }
  func.func @transform_1(%arg0: i32, %arg1: i32) -> (i32, i32, i32, i32) {
    %c0_i32 = arith.constant 0 : i32
    %c0_i32_0 = arith.constant 0 : i32
    %c0_i32_1 = arith.constant 0 : i32
    %c0_i32_2 = arith.constant 0 : i32
    %c0_i32_3 = arith.constant 0 : i32
    return %c0_i32, %c0_i32_0, %c0_i32_1, %c0_i32_2 : i32, i32, i32, i32
  }
  func.func @transform_2(%arg0: i32, %arg1: i32) -> (i32, i32) {
    %c0_i32 = arith.constant 0 : i32
    %c0_i32_0 = arith.constant 0 : i32
    %c0_i32_1 = arith.constant 0 : i32
    return %c0_i32, %c0_i32_0 : i32, i32
  }
  func.func @transform_3(%arg0: i32, %arg1: i32) -> (i32, i32) {
    %0 = arith.muli %arg1, %arg0 : i32
    %c0_i32 = arith.constant 0 : i32
    %c0_i32_0 = arith.constant 0 : i32
    return %0, %c0_i32 : i32, i32
  }
}

module attributes {stable_mosaic.version = 11 : i64} {
  func.func @_conv_stats_kernel(%arg0: i32, %arg1: memref<128x128xbf16, #tpu.memory_space<vmem>>, %arg2: memref<128x128xbf16, #tpu.memory_space<vmem>>, %arg3: memref<128x128xbf16, #tpu.memory_space<vmem>>, %arg4: memref<1x8x128xf32, #tpu.memory_space<vmem>>, %arg5: memref<1x8x128xf32, #tpu.memory_space<vmem>>) attributes {dimension_semantics = [#tpu.dimension_semantics<parallel>], iteration_bounds = array<i64: 1>, scalar_prefetch = 0 : i64, scratch_operands = 0 : i64, tpu.core_type = #tpu.core_type<tc>, window_params = [{transform_indices = @transform_0, window_bounds = array<i64: 128, 128>}, {pipeline_mode = #tpu.pipeline_mode<synchronous>, transform_indices = @transform_1, window_bounds = array<i64: 128, 128>}, {transform_indices = @transform_2, window_bounds = array<i64: 128, 128>}, {transform_indices = @transform_3, window_bounds = array<i64: 1, 8, 128>}, {transform_indices = @transform_4, window_bounds = array<i64: 1, 8, 128>}]} {
    %c0 = arith.constant 0 : index
    %c0_0 = arith.constant 0 : index
    %0 = vector.load %arg1[%c0, %c0_0] : memref<128x128xbf16, #tpu.memory_space<vmem>>, vector<128x128xbf16>
    %c0_1 = arith.constant 0 : index
    %c0_2 = arith.constant 0 : index
    %1 = vector.load %arg2[%c0_1, %c0_2] : memref<128x128xbf16, #tpu.memory_space<vmem>>, vector<128x128xbf16>
    %cst = arith.constant dense<0.000000e+00> : vector<128x128xf32>
    %2 = tpu.matmul %0, %1, %cst {dimension_numbers = #tpu.dot_dimension_numbers<[1], [0], [0], [1], [0, 0, 1, 1], [], []>} : vector<128x128xbf16>, vector<128x128xbf16>, vector<128x128xf32> -> vector<128x128xf32>
    %3 = arith.truncf %2 : vector<128x128xf32> to vector<128x128xbf16>
    %c0_3 = arith.constant 0 : index
    %c0_4 = arith.constant 0 : index
    %4 = vector.load %arg3[%c0_3, %c0_4] : memref<128x128xbf16, #tpu.memory_space<vmem>>, vector<128x128xbf16>
    tpu.vector_store %arg3[%c0_3, %c0_4], %3 {strides = array<i32>} : memref<128x128xbf16, #tpu.memory_space<vmem>>, vector<128x128xbf16>,
    %5 = vector.shape_cast %2 : vector<128x128xf32> to vector<16x8x128xf32>
    %cst_5 = arith.constant dense<0.000000e+00> : vector<8x128xf32>
    %6 = vector.multi_reduction <add>, %5, %cst_5 [0] : vector<16x8x128xf32> to vector<8x128xf32>
    %7 = vector.shape_cast %6 : vector<8x128xf32> to vector<1x8x128xf32>
    %c0_6 = arith.constant 0 : index
    %c0_7 = arith.constant 0 : index
    %c0_8 = arith.constant 0 : index
    %8 = vector.load %arg4[%c0_6, %c0_7, %c0_8] : memref<1x8x128xf32, #tpu.memory_space<vmem>>, vector<1x8x128xf32>
    tpu.vector_store %arg4[%c0_6, %c0_7, %c0_8], %7 {strides = array<i32>} : memref<1x8x128xf32, #tpu.memory_space<vmem>>, vector<1x8x128xf32>,
    %9 = arith.mulf %5, %5 : vector<16x8x128xf32>
    %cst_9 = arith.constant dense<0.000000e+00> : vector<8x128xf32>
    %10 = vector.multi_reduction <add>, %9, %cst_9 [0] : vector<16x8x128xf32> to vector<8x128xf32>
    %11 = vector.shape_cast %10 : vector<8x128xf32> to vector<1x8x128xf32>
    %c0_10 = arith.constant 0 : index
    %c0_11 = arith.constant 0 : index
    %c0_12 = arith.constant 0 : index
    %12 = vector.load %arg5[%c0_10, %c0_11, %c0_12] : memref<1x8x128xf32, #tpu.memory_space<vmem>>, vector<1x8x128xf32>
    tpu.vector_store %arg5[%c0_10, %c0_11, %c0_12], %11 {strides = array<i32>} : memref<1x8x128xf32, #tpu.memory_space<vmem>>, vector<1x8x128xf32>,
    return
  }
  func.func @transform_0(%arg0: i32) -> (i32, i32) {
    %c0_i32 = arith.constant 0 : i32
    %c0_i32_0 = arith.constant 0 : i32
    return %arg0, %c0_i32 : i32, i32
  }
  func.func @transform_1(%arg0: i32) -> (i32, i32) {
    %c0_i32 = arith.constant 0 : i32
    %c0_i32_0 = arith.constant 0 : i32
    %c0_i32_1 = arith.constant 0 : i32
    return %c0_i32, %c0_i32_0 : i32, i32
  }
  func.func @transform_2(%arg0: i32) -> (i32, i32) {
    %c0_i32 = arith.constant 0 : i32
    %c0_i32_0 = arith.constant 0 : i32
    return %arg0, %c0_i32 : i32, i32
  }
  func.func @transform_3(%arg0: i32) -> (i32, i32, i32) {
    %c0_i32 = arith.constant 0 : i32
    %c0_i32_0 = arith.constant 0 : i32
    %c0_i32_1 = arith.constant 0 : i32
    return %arg0, %c0_i32, %c0_i32_0 : i32, i32, i32
  }
  func.func @transform_4(%arg0: i32) -> (i32, i32, i32) {
    %c0_i32 = arith.constant 0 : i32
    %c0_i32_0 = arith.constant 0 : i32
    %c0_i32_1 = arith.constant 0 : i32
    return %arg0, %c0_i32, %c0_i32_0 : i32, i32, i32
  }
}

</mosaic_0001>

<bundles_post_ra>
// kernel: tpu_custom_call.1
= control target key start
LH: loop header
LB: loop body
LE: loop exit
PB: predicated region body
PF: predicated region fallthrough
CT: control target
= control target key end

     0   :  { %8 = vsyncpa [#allocation6], 0  ;;  %s1697_s0 = inlined_call_operand.vmem [shape: bf16[2,9,9,12], index: 0, kind: input, shape index: {}]   ;;  %s1698_s1 = inlined_call_operand.vmem [shape: bf16[2,2,12,128], index: 1, kind: input, shape index: {}]   ;;  %s1699_s2 = inlined_call_operand.vmem [shape: f32[2,128], index: 2, kind: input, shape index: {}]   ;;  %s1700_s3 = inlined_call_operand.hbm [shape: f32[128,128], index: 3, kind: output, shape index: {}]  }
   0x1   :  { %10 = vsyncpa [#allocation6 + $0x1], 0  ;;  %s1406_s12 = smov 0   ;;  %s1408_s13 = smov 0  }
   0x2   :  { %s1410_s14 = smov 0   ;;  %s1412_s15 = smov 0  }
   0x3   :  { %s1414_s16 = smov 0   ;;  %s1416_s17 = smov 0  }
   0x4   :  { %s1418_s18 = smov 0   ;;  %s1420_s19 = smov 0  }
   0x5 LB: > { %s1033_s20 = sadd.s32 4294967295, %s1380_s19   ;;  %s1034_s21 = sadd.s32 4294967294, %s1380_s19   ;;  %s1380_s19 = sphi %s1420_s19, %s16_s19   ;;  %s1376_s18 = sphi %s1418_s18, %s1711_s18   ;;  %s1372_s17 = sphi %s1416_s17, %s1710_s17   ;;  %s1368_s16 = sphi %s1414_s16, %s1709_s16   ;;  %s1364_s15 = sphi %s1412_s15, %s1708_s15   ;;  %s1360_s14 = sphi %s1410_s14, %s1707_s14   ;;  %s1356_s13 = sphi %s1408_s13, %s1706_s13   ;;  %s1352_s12 = sphi %s1406_s12, %s1705_s12  }
   0x6   : > { %s25_s22 = sadd.s32 1, %s1372_s17  ;;  %s28_s23 = sadd.s32 1, %s1376_s18 }
   0x7   : > { %p26_p0 = scmp.ge.s32.totalorder %s25_s22, 2  ;;  %s104_s24 = smul.u32 %s1372_s17, %s1376_s18 }
   0x8   : > { %p119_p1 = scmp.ne.s32.totalorder %s1360_s14, %s1356_s13  ;;  %p120_p2 = scmp.eq.s32.totalorder %s1033_s20, 3 }
   0x9   : > { %s1713_s22 = smov (%p26_p0, %s25_s22), 0  ;;  %s1715_s23 = smov (!%p26_p0, %s28_s23), %s1376_s18 }
   0xa   : > { %p125_p3 = scmp.ne.s32.totalorder %s1356_s13, %s1352_s12  ;;  %p30_p4 = scmp.ge.s32.totalorder %s1715_s23, 2 }
   0xb   : > { %p126_p5 = scmp.eq.s32.totalorder %s1034_s21, 3  ;;  %p1459_p6 = por %p120_p2, %p119_p1 }
   0xc   : > { %p1037_p7 = scmp.ge.s32.totalorder %s1380_s19, 1  ;;  %s1717_s23 = smov (%p30_p4, %s1715_s23), 0 }
   0xd   : > { %p1466_p8 = por %p126_p5, %p125_p3  ;;  %p162_p9 = scmp.lt.s32.totalorder %s1380_s19, 5 }
   0xe   : > { %s105_s27 = smul.u32 %s1717_s23, %s1713_s22  ;;  %s109_s29 = sadd.s32 1, %s1360_s14 }
   0xf   : > { %p163_p10 = pnand %p1037_p7, %p162_p9 }
  0x10   : > { %s106_s28 = ssub.s32 %s104_s24, %s105_s27  ;;  %s185_s4 = sand.u32 (!%p163_p10), 1, %s1356_s13  }
  0x11   : > { %p107_p11 = scmp.eq.s32.totalorder %s106_s28, 0  ;;  %166 = sbr.rel (%p163_p10) target bundleno = 360 (0x168), region = 32 }
  0x12   : > { %s188_s5 = ssub.s32 (!%p163_p10), 1, %s1368_s16  ;;  %s1038_s6 = sshll.u32 (!%p163_p10), %s185_s4, 6 }
  0x13   : > { %s1475_s30 = scalar_select %p107_p11, %s1360_s14, %s109_s29  }
  0x14   : > { %s189_s7 = smul.u32 (!%p163_p10), %s1364_s15, %s188_s5  ;;  %s1487_s20 = scalar_lea.vmem (!%p163_p10), [#allocation5], %s1038_s6 }
  0x15   : > { %p1040_p13 = scmp.ne.s32.totalorder (!%p163_p10), %s1368_s16, 0 }
  0x16   : > { %p190_p12 = scmp.lt.s32.totalorder %s189_s7, 1  ;;  %p1041_p0 = scmp.ne.s32.totalorder (!%p1040_p13), %s1364_s15, 0 }
  0x17   : > { %203 = sbr.rel (%p1040_p13) target bundleno = 258 (0x102), region = 36 }
  0x18   : > { %s1719_s7 = smov (!%p190_p12, %s189_s7), 1 }
  0x19   : > { %s1204_s8 = smul.u32 72, %s1719_s7 }
  0x1b   : > { %s1485_s11 = scalar_lea.vmem %s1697_s0, %s1204_s8 }
  0x1c   : > { %207 = sbr.rel (%p1041_p0) target bundleno = 36 (0x24), region = 40 }
  0x21   : > { %v1382_v0 = vmov 0.0  }
  0x22   : > { %208 = vst [vmem:[#allocation3] sm:$0xff] %v1382_v0 }
  0x23   : > { %209 = vst [vmem:[#allocation3 + $0x8] sm:$0xff] %v1382_v0 }
  0x24 PF: > { %vm376_vm0 = vcmask 1045504   ;;  %v1104_v1 = vld [vmem:[%s1698_s1 + $0x10] sm:$0xf]  ;;  %v1157_v2 = vld [vmem:[%s1698_s1 + $0x10] sm:$0x30]  ;;  %vm363_vm1 = vcmask 97280  }
  0x25   : > { %v1105_v3 = vor.u32 %v1157_v2, %v1104_v1  ;;  %v1070_v4 = vld [vmem:[%s1698_s1] sm:$0xf]  ;;  %v1151_v5 = vld [vmem:[%s1698_s1] sm:$0x30]  ;;  %v1088_v6 = vld [vmem:[%s1485_s11 + $0x8] sm:$0xf] }
  0x26   : > { %v1071_v7 = vor.u32 %v1151_v5, %v1070_v4  ;;  %v1153_v8 = vld [vmem:[%s1485_s11 + $0xc] sm:$0xf0]  ;;  %v1054_v9 = vld [vmem:[%s1485_s11] sm:$0xf]  ;;  %v1147_v10 = vld [vmem:[%s1485_s11 + $0x4] sm:$0xf0] }
  0x27   : > { %v528_v11 = vsel %vm376_vm0, %v1105_v3, 0  ;;  %v1089_v12 = vor.u32 %v1153_v8, %v1088_v6  ;;  %v1046_v13 = vld [vmem:[%s1698_s1 + $0x8] sm:$0xf]  ;;  %v1152_v14 = vld [vmem:[%s1698_s1 + $0x8] sm:$0x30]  ;;  %v1055_v16 = vor.u32 %v1147_v10, %v1054_v9 }
  0x28   : > { %537 = vmatpush.bf16.msra.mxu2 %v528_v11  ;;  %v447_v15 = vsel %vm376_vm0, %v1071_v7, 0  ;;  %v1047_v17 = vor.u32 %v1152_v14, %v1046_v13  ;;  %v1130_v18 = vld [vmem:[%s1698_s1 + $0x18] sm:$0xf]  ;;  %v1158_v19 = vld [vmem:[%s1698_s1 + $0x18] sm:$0x30] }
  0x29   : > { %456 = vmatpush.bf16.msra.mxu1 %v447_v15  ;;  %v1131_v20 = vor.u32 %v1158_v19, %v1130_v18  ;;  %v210_v21 = vld [vmem:[%s1485_s11] sm:$0xf]  ;;  %v211_v22 = vld [vmem:[%s1485_s11 + $0x8] sm:$0xf]  ;;  %v220_v23 = vld [vmem:[%s1485_s11 + $0x4] sm:$0x1] }
  0x2a   : > { %v378_v24 = vsel %vm376_vm0, %v1047_v17, 0  ;;  %v221_v25 = vld [vmem:[%s1485_s11 + $0xc] sm:$0x1]  ;;  %vm228_vm2 = vsmask.f32 3328  ;;  %v232_v26 = vshrl.u32 %v210_v21, 16 }
  0x2b   : > { %1106 = vmatmul.msk.bf16.vlgmr.msra.gmra.mxu2 %vm363_vm1, %v1089_v12  ;;  %387 = vmatpush.bf16.msra.mxu0 %v378_v24  ;;  %v728_v27 = vsel %vm376_vm0, %v1131_v20, 0  ;;  %vm229_vm3 = vsmask.f32 7440  ;;  %v235_v28 = vshll.u32 %v210_v21, 16  ;;  %v241_v29 = vshll.u32 %v220_v23, 16 }
  0x2c   : > { %1072 = vmatmul.msk.bf16.vlgmr.msra.gmra.mxu1 %vm363_vm1, %v1055_v16  ;;  %737 = vmatpush.bf16.msra.mxu3 %v728_v27  ;;  %v234_v30 = vrot.slane %v232_v26, 4  ;;  %v246_v31 = vshrl.u32 %v211_v22, 16  ;;  %v249_v32 = vshll.u32 %v211_v22, 16  ;;  %v255_v33 = vshll.u32 %v221_v25, 16  ;;  %v1110_v34 = vld [vmem:[%s1485_s11 + $0x8] sm:$0xf]  ;;  %vm1536_vm4 = vmor %vm228_vm2, %vm229_vm3 }
  0x2d   : > { %v237_v35 = vrot.slane %v235_v28, 5  ;;  %v243_v36 = vrot.slane %v241_v29, 5  ;;  %v1111_v37 = vld [vmem:[%s1485_s11 + $0xc] sm:$0x1]  ;;  %v1112_v38 = vld [vmem:[%s1485_s11 + $0x10] sm:$0xf] }
  0x2e   : > { %v248_v39 = vrot.slane %v246_v31, 4  ;;  %v251_v40 = vrot.slane %v249_v32, 5  ;;  %v257_v41 = vrot.slane %v255_v33, 5  ;;  %v1113_v42 = vld [vmem:[%s1485_s11 + $0x14] sm:$0x1]  ;;  %v584_v43 = vshrl.u32 %v1110_v34, 16 }
  0x2f   : > { %v238_v44 = vor.u32 %v237_v35, %v234_v30  ;;  %v587_v45 = vshll.u32 %v1110_v34, 16  ;;  %v593_v46 = vshll.u32 %v1111_v37, 16  ;;  %v598_v47 = vshrl.u32 %v1112_v38, 16  ;;  %v1092_v48 = vld [vmem:[%s1485_s11 + $0x18] sm:$0xf] }
  0x30   : > { %v252_v50 = vor.u32 %v251_v40, %v248_v39  ;;  %v586_v51 = vrot.slane %v584_v43, 4  ;;  %v601_v52 = vshll.u32 %v1112_v38, 16  ;;  %v607_v53 = vshll.u32 %v1113_v42, 16  ;;  %v1154_v54 = vld [vmem:[%s1485_s11 + $0x1c] sm:$0xf0] }
  0x31   : > { %v239_v55 = vrot.slane %v238_v44, 4  ;;  %v589_v56 = vrot.slane %v587_v45, 5  ;;  %v600_v57 = vrot.slane %v598_v47, 4  ;;  %v1058_v58 = vld [vmem:[%s1485_s11 + $0x10] sm:$0xf]  ;;  %v595_v60 = vrot.slane %v593_v46, 5 }
  0x32   : > { %v253_v59 = vrot.slane %v252_v50, 4  ;;  %v603_v61 = vrot.slane %v601_v52, 5  ;;  %v609_v62 = vrot.slane %v607_v53, 5  ;;  %v1148_v63 = vld [vmem:[%s1485_s11 + $0x14] sm:$0xf0]  ;;  %v1093_v2 = vor.u32 %v1154_v54, %v1092_v48 }
  0x33   : > { %v244_v0 = vsel %vm1536_vm4, %v239_v55, %v243_v36  ;;  %v590_v1 = vor.u32 %v589_v56, %v586_v51  ;;  %v1059_v3 = vor.u32 %v1148_v63, %v1058_v58  ;;  %v212_v4 = vld [vmem:[%s1485_s11 + $0x10] sm:$0xf]  ;;  %v213_v5 = vld [vmem:[%s1485_s11 + $0x18] sm:$0xf]  ;;  %v222_v6 = vld [vmem:[%s1485_s11 + $0x14] sm:$0x1] }
  0x34   : > { %v258_v7 = vsel %vm1536_vm4, %v253_v59, %v257_v41  ;;  %v346_v8 = vunpack.c.l.b16 %v244_v0  ;;  %v604_v9 = vor.u32 %v603_v61, %v600_v57  ;;  %v260_v10 = vshrl.u32 %v212_v4, 16  ;;  %v223_v13 = vld [vmem:[%s1485_s11 + $0x1c] sm:$0x1]  ;;  %v1114_v20 = vld [vmem:[%s1485_s11 + $0x18] sm:$0xf] }
  0x35   : > { %v347_v11 = vunpack.c.l.b16 %v258_v7  ;;  %v591_v12 = vrot.slane %v590_v1, 4  ;;  %v263_v14 = vshll.u32 %v212_v4, 16  ;;  %v269_v15 = vshll.u32 %v222_v6, 16  ;;  %v1115_v25 = vld [vmem:[%s1485_s11 + $0x1c] sm:$0x1] }
  0x36   : > { %v605_v16 = vrot.slane %v604_v9, 4  ;;  %v262_v17 = vrot.slane %v260_v10, 4  ;;  %v274_v18 = vshrl.u32 %v213_v5, 16  ;;  %v277_v19 = vshll.u32 %v213_v5, 16  ;;  %v1116_v26 = vld [vmem:[%s1485_s11 + $0x20] sm:$0xf] }
  0x37   : > { %v354_v21 = vpack.c.b16 %v347_v11, %v346_v8  ;;  %v596_v22 = vsel %vm1536_vm4, %v591_v12, %v595_v60  ;;  %v265_v23 = vrot.slane %v263_v14, 5  ;;  %v271_v24 = vrot.slane %v269_v15, 5  ;;  %v1117_v36 = vld [vmem:[%s1485_s11 + $0x24] sm:$0x1]  ;;  %v1562_v44 = vld [vmem:[%s1485_s11 + $0x28] sm:$0xf] }
  0x38   : > { %v610_v27 = vsel %vm1536_vm4, %v605_v16, %v609_v62  ;;  %v698_v28 = vunpack.c.l.b16 %v596_v22  ;;  %v276_v29 = vrot.slane %v274_v18, 4  ;;  %v279_v30 = vrot.slane %v277_v19, 5  ;;  %v1566_v47 = vld [vmem:[%s1485_s11 + $0x2c] sm:$0xf0]  ;;  %v214_v48 = vld [vmem:[%s1485_s11 + $0x20] sm:$0xf] }
  0x39   : > { %1048 = vmatmul.msk.bf16.vlgmr.msra.gmra.mxu0 %vm363_vm1, %v354_v21  ;;  %v699_v31 = vunpack.c.l.b16 %v610_v27  ;;  %v266_v32 = vor.u32 %v265_v23, %v262_v17  ;;  %v283_v33 = vshll.u32 %v223_v13, 16  ;;  %v612_v34 = vshrl.u32 %v1114_v20, 16  ;;  %v215_v54 = vld [vmem:[%s1485_s11 + $0x28] sm:$0xf]  ;;  %v1062_v58 = vld [vmem:[%s1485_s11 + $0x20] sm:$0xf] }
  0x3a   : > { %v280_v35 = vor.u32 %v279_v30, %v276_v29  ;;  %v615_v37 = vshll.u32 %v1114_v20, 16  ;;  %v621_v38 = vshll.u32 %v1115_v25, 16  ;;  %v626_v39 = vshrl.u32 %v1116_v26, 16  ;;  %v1149_v62 = vld [vmem:[%s1485_s11 + $0x24] sm:$0xf0] }
  0x3b   : > { %v706_v40 = vpack.c.b16 %v699_v31, %v698_v28  ;;  %1107 = vmatmul.msk.bf16.gmra.mxu2 %vm363_vm1, %v1093_v2  ;;  %v267_v41 = vrot.slane %v266_v32, 4  ;;  %v285_v42 = vrot.slane %v283_v33, 5  ;;  %v614_v43 = vrot.slane %v612_v34, 4  ;;  %v224_v63 = vld [vmem:[%s1485_s11 + $0x24] sm:$0x1] }
  0x3c   : > { %1073 = vmatmul.msk.bf16.gmra.mxu1 %vm363_vm1, %v1059_v3  ;;  %v281_v45 = vrot.slane %v280_v35, 4  ;;  %v617_v46 = vrot.slane %v615_v37, 5  ;;  %v628_v51 = vrot.slane %v626_v39, 4  ;;  %v629_v52 = vshll.u32 %v1116_v26, 16  ;;  %v225_v3 = vld [vmem:[%s1485_s11 + $0x2c] sm:$0x1] }
  0x3d   : > { %1132 = vmatmul.msk.bf16.vlgmr.msra.gmra.mxu3 %vm363_vm1, %v706_v40  ;;  %v272_v50 = vsel %vm1536_vm4, %v267_v41, %v271_v24  ;;  %v635_v53 = vshll.u32 %v1117_v36, 16  ;;  %v623_v57 = vrot.slane %v621_v38, 5  ;;  %v288_v0 = vshrl.u32 %v214_v48, 16  ;;  %v1118_v10 = vld [vmem:[%s1485_s11 + $0x28] sm:$0xf] }
  0x3e   : > { %v286_v55 = vsel %vm1536_vm4, %v281_v45, %v285_v42  ;;  %v618_v56 = vor.u32 %v617_v46, %v614_v43  ;;  %v348_v59 = vunpack.c.l.b16 %v272_v50  ;;  %v631_v61 = vrot.slane %v629_v52, 5  ;;  %v1120_v15 = vld [vmem:[%s1485_s11 + $0x30] sm:$0xf]  ;;  %v1119_v22 = vld [vmem:[%s1485_s11 + $0x2c] sm:$0x1] }
  0x3f   : > { %v349_v60 = vunpack.c.l.b16 %v286_v55  ;;  %v1097_v2 = vor.u32 %v1566_v47, %v1562_v44  ;;  %v291_v4 = vshll.u32 %v214_v48, 16  ;;  %v302_v5 = vshrl.u32 %v215_v54, 16  ;;  %v1121_v28 = vld [vmem:[%s1485_s11 + $0x34] sm:$0x1]  ;;  %v216_v44 = vld [vmem:[%s1485_s11 + $0x30] sm:$0xf] }
  0x40   : > { %v619_v1 = vrot.slane %v618_v56, 4  ;;  %v632_v6 = vor.u32 %v631_v61, %v628_v51  ;;  %v637_v7 = vrot.slane %v635_v53, 5  ;;  %v290_v8 = vrot.slane %v288_v0, 4  ;;  %v217_v45 = vld [vmem:[%s1485_s11 + $0x38] sm:$0xf] }
  0x41   : > { %v305_v9 = vshll.u32 %v215_v54, 16  ;;  %v293_v12 = vrot.slane %v291_v4, 5  ;;  %v297_v13 = vshll.u32 %v224_v63, 16  ;;  %v304_v14 = vrot.slane %v302_v5, 4  ;;  %v227_v5 = vld [vmem:[%s1485_s11 + $0x3c] sm:$0x1] }
  0x42   : > { %v624_v11 = vsel %vm1536_vm4, %v619_v1, %v623_v57  ;;  %v355_v16 = vpack.c.b16 %v349_v60, %v348_v59  ;;  %v633_v17 = vrot.slane %v632_v6, 4  ;;  %v1063_v18 = vor.u32 %v1149_v62, %v1062_v58  ;;  %v1122_v58 = vld [vmem:[%s1485_s11 + $0x38] sm:$0xf]  ;;  %v1124_v59 = vld [vmem:[%s1485_s11 + $0x40] sm:$0xf] }
  0x43   : > { %v307_v19 = vrot.slane %v305_v9, 5  ;;  %v294_v20 = vor.u32 %v293_v12, %v290_v8  ;;  %v311_v21 = vshll.u32 %v225_v3, 16  ;;  %v640_v23 = vshrl.u32 %v1118_v10, 16  ;;  %v226_v1 = vld [vmem:[%s1485_s11 + $0x34] sm:$0x1] }
  0x44   : > { %v643_v24 = vshll.u32 %v1118_v10, 16  ;;  %v638_v25 = vsel %vm1536_vm4, %v633_v17, %v637_v7  ;;  %v700_v26 = vunpack.c.l.b16 %v624_v11  ;;  %v654_v29 = vshrl.u32 %v1120_v15, 16  ;;  %v1100_v12 = vld [vmem:[%s1485_s11 + $0x38] sm:$0xf] }
  0x45   : > { %v308_v27 = vor.u32 %v307_v19, %v304_v14  ;;  %v701_v30 = vunpack.c.l.b16 %v638_v25  ;;  %v299_v31 = vrot.slane %v297_v13, 5  ;;  %v642_v32 = vrot.slane %v640_v23, 4  ;;  %v1156_v13 = vld [vmem:[%s1485_s11 + $0x3c] sm:$0xf0]  ;;  %v1150_v17 = vld [vmem:[%s1485_s11 + $0x34] sm:$0xf0] }
  0x46   : > { %v645_v33 = vrot.slane %v643_v24, 5  ;;  %v295_v34 = vrot.slane %v294_v20, 4  ;;  %v649_v35 = vshll.u32 %v1119_v22, 16  ;;  %v656_v36 = vrot.slane %v654_v29, 4 }
  0x47   : > { %v657_v37 = vshll.u32 %v1120_v15, 16  ;;  %v309_v38 = vrot.slane %v308_v27, 4  ;;  %v313_v39 = vrot.slane %v311_v21, 5  ;;  %v663_v41 = vshll.u32 %v1121_v28, 16  ;;  %v1123_v21 = vld [vmem:[%s1485_s11 + $0x3c] sm:$0x1] }
  0x48   : > { %v646_v40 = vor.u32 %v645_v33, %v642_v32  ;;  %v707_v42 = vpack.c.b16 %v701_v30, %v700_v26  ;;  %v300_v46 = vsel %vm1536_vm4, %v295_v34, %v299_v31  ;;  %v651_v47 = vrot.slane %v649_v35, 5  ;;  %v1125_v27 = vld [vmem:[%s1485_s11 + $0x44] sm:$0x1] }
  0x49   : > { %1049 = vmatmul.msk.bf16.gmra.mxu0 %vm363_vm1, %v355_v16  ;;  %v659_v43 = vrot.slane %v657_v37, 5  ;;  %v314_v50 = vsel %vm1536_vm4, %v309_v38, %v313_v39  ;;  %v665_v52 = vrot.slane %v663_v41, 5  ;;  %v316_v53 = vshrl.u32 %v216_v44, 16  ;;  %v1066_v16 = vld [vmem:[%s1485_s11 + $0x30] sm:$0xf]  ;;  %s1159_s11 = sshll.u32 %s1364_s15, 5 }
  0x4a   : > { %v647_v51 = vrot.slane %v646_v40, 4  ;;  %v319_v55 = vshll.u32 %v216_v44, 16  ;;  %v330_v56 = vshrl.u32 %v217_v45, 16  ;;  %v333_v57 = vshll.u32 %v217_v45, 16  ;;  %s1628_s5 = scalar_lea.vmem [#allocation2], %s1159_s11 }
  0x4b   : > { %1108 = vmatmul.msk.bf16.gmra.mxu2 %vm363_vm1, %v1097_v2  ;;  %v660_v48 = vor.u32 %v659_v43, %v656_v36  ;;  %v350_v60 = vunpack.c.l.b16 %v300_v46  ;;  %v351_v61 = vunpack.c.l.b16 %v314_v50  ;;  %v318_v63 = vrot.slane %v316_v53, 4 }
  0x4c   : > { %1074 = vmatmul.msk.bf16.gmra.mxu1 %vm363_vm1, %v1063_v18  ;;  %v652_v62 = vsel %vm1536_vm4, %v647_v51, %v651_v47  ;;  %v321_v2 = vrot.slane %v319_v55, 5  ;;  %v332_v3 = vrot.slane %v330_v56, 4  ;;  %v335_v4 = vrot.slane %v333_v57, 5 }
  0x4d   : > { %1133 = vmatmul.msk.bf16.gmra.mxu3 %vm363_vm1, %v707_v42  ;;  %v661_v54 = vrot.slane %v660_v48, 4  ;;  %v668_v6 = vshrl.u32 %v1122_v58, 16  ;;  %v671_v7 = vshll.u32 %v1122_v58, 16  ;;  %v682_v8 = vshrl.u32 %v1124_v59, 16 }
  0x4e   : > { %v685_v9 = vshll.u32 %v1124_v59, 16  ;;  %v356_v10 = vpack.c.b16 %v351_v61, %v350_v60  ;;  %v702_v11 = vunpack.c.l.b16 %v652_v62  ;;  %v325_v14 = vshll.u32 %v226_v1, 16 }
  0x4f   : > { %v666_v0 = vsel %vm1536_vm4, %v661_v54, %v665_v52  ;;  %v322_v18 = vor.u32 %v321_v2, %v318_v63  ;;  %v336_v19 = vor.u32 %v335_v4, %v332_v3  ;;  %v339_v20 = vshll.u32 %v227_v5, 16 }
  0x50   : > { %v703_v15 = vunpack.c.l.b16 %v666_v0  ;;  %v670_v22 = vrot.slane %v668_v6, 4  ;;  %v673_v23 = vrot.slane %v671_v7, 5  ;;  %v684_v24 = vrot.slane %v682_v8, 4 }
  0x51   : > { %v687_v25 = vrot.slane %v685_v9, 5  ;;  %v1101_v26 = vor.u32 %v1156_v13, %v1100_v12  ;;  %v1067_v28 = vor.u32 %v1150_v17, %v1066_v16  ;;  %v327_v29 = vrot.slane %v325_v14, 5 }
  0x52   : > { %v708_v30 = vpack.c.b16 %v703_v15, %v702_v11  ;;  %v323_v31 = vrot.slane %v322_v18, 4  ;;  %v341_v32 = vrot.slane %v339_v20, 5  ;;  %v677_v33 = vshll.u32 %v1123_v21, 16 }
  0x53   : > { %v337_v34 = vrot.slane %v336_v19, 4  ;;  %v674_v35 = vor.u32 %v673_v23, %v670_v22  ;;  %v688_v36 = vor.u32 %v687_v25, %v684_v24  ;;  %v691_v37 = vshll.u32 %v1125_v27, 16 }
  0x54   : > { %v328_v38 = vsel %vm1536_vm4, %v323_v31, %v327_v29  ;;  %v679_v39 = vrot.slane %v677_v33, 5 }
  0x55   : > { %v342_v40 = vsel %vm1536_vm4, %v337_v34, %v341_v32  ;;  %v675_v41 = vrot.slane %v674_v35, 4  ;;  %v689_v42 = vrot.slane %v688_v36, 4  ;;  %v693_v43 = vrot.slane %v691_v37, 5 }
  0x56   : > { %v352_v44 = vunpack.c.l.b16 %v328_v38  ;;  %v353_v45 = vunpack.c.l.b16 %v342_v40 }
  0x57   : > { %v680_v46 = vsel %vm1536_vm4, %v675_v41, %v679_v39  ;;  %v694_v47 = vsel %vm1536_vm4, %v689_v42, %v693_v43 }
  0x58   : > { %v357_v48 = vpack.c.b16 %v353_v45, %v352_v44  ;;  %v704_v50 = vunpack.c.l.b16 %v680_v46  ;;  %v705_v51 = vunpack.c.l.b16 %v694_v47 }
  0x59   : > { %1050 = vmatmul.msk.bf16.gmra.mxu0 %vm363_vm1, %v356_v10 }
  0x5a   : > { %v709_v52 = vpack.c.b16 %v705_v51, %v704_v50 }
  0x5b   : > { %1109 = vmatmul.msk.bf16.gmra.mxu2 %vm363_vm1, %v1101_v26 }
  0x5c   : > { %1075 = vmatmul.msk.bf16.gmra.mxu1 %vm363_vm1, %v1067_v28 }
  0x5d   : > { %1134 = vmatmul.msk.bf16.gmra.mxu3 %vm363_vm1, %v708_v30 }
  0x69   : > { %1051 = vmatmul.msk.bf16.gmra.mxu0 %vm363_vm1, %v357_v48 }
  0x6d   : > { %1135 = vmatmul.msk.bf16.gmra.mxu3 %vm363_vm1, %v709_v52 }
  0xa9   : > { %v458_v53 = vpop.f32.mrf.mxu1 }
  0xae   : > { %v539_v54 = vpop.f32.mrf.mxu2 }
  0xb1   : > { %v460_v56 = vpop.f32.mrf.mxu1 }
  0xb6   : > { %v389_v55 = vpop.f32.mrf.mxu0  ;;  %v541_v57 = vpop.f32.mrf.mxu2 }
  0xb7   : > { %v459_v61 = vadd.f32 %v458_v53, %v389_v55 }
  0xb9   : > { %v463_v60 = vpop.f32.mrf.mxu1  ;;  %v559_v63 = vadd.f32 %v539_v54, %v459_v61 }
  0xbe   : > { %v391_v58 = vpop.f32.mrf.mxu0  ;;  %v544_v62 = vpop.f32.mrf.mxu2 }
  0xbf   : > { %v461_v49 = vadd.f32 %v460_v56, %v391_v58 }
  0xc0   : > { %v739_v59 = vpop.f32.mrf.mxu3 }
  0xc1   : > { %v560_v1 = vadd.f32 %v541_v57, %v461_v49  ;;  %v759_v3 = vadd.f32 %v739_v59, %v559_v63  ;;  %v465_v5 = vpop.f32.mrf.mxu1 }
  0xc3   : > { %v798_v38 = vmul.f32 %v759_v3, %v759_v3 }
  0xc6   : > { %v394_v0 = vpop.f32.mrf.mxu0  ;;  %v546_v7 = vpop.f32.mrf.mxu2 }
  0xc7   : > { %v464_v10 = vadd.f32 %v463_v60, %v394_v0 }
  0xc8   : > { %v741_v2 = vpop.f32.mrf.mxu3 }
  0xc9   : > { %v760_v4 = vadd.f32 %v741_v2, %v560_v1  ;;  %v468_v12 = vpop.f32.mrf.mxu1  ;;  %v561_v13 = vadd.f32 %v544_v62, %v464_v10  ;;  %v786_v1 = vld [vmem:[#allocation3] sm:$0xff] }
  0xcb   : > { %v1165_v6 = vpack.c.bf16 %v760_v4, %v759_v3  ;;  %v799_v36 = vmul.f32 %v760_v4, %v760_v4  ;;  %v787_v40 = vadd.f32 %v760_v4, %v759_v3 }
  0xcd   : > { %1166 = vst [vmem:[%s1628_s5] sm:$0xff] %v1165_v6   ;;  %v806_v42 = vadd.f32 %v799_v36, %v798_v38  ;;  %v797_v6 = vld [vmem:[#allocation3 + $0x8] sm:$0xff] }
  0xce   : > { %v396_v8 = vpop.f32.mrf.mxu0  ;;  %v549_v17 = vpop.f32.mrf.mxu2 }
  0xcf   : > { %v466_v11 = vadd.f32 %v465_v5, %v396_v8 }
  0xd0   : > { %v744_v9 = vpop.f32.mrf.mxu3 }
  0xd1   : > { %v562_v15 = vadd.f32 %v546_v7, %v466_v11  ;;  %v761_v18 = vadd.f32 %v744_v9, %v561_v13  ;;  %v470_v21 = vpop.f32.mrf.mxu1 }
  0xd3   : > { %v800_v39 = vmul.f32 %v761_v18, %v761_v18  ;;  %v788_v45 = vadd.f32 %v787_v40, %v761_v18 }
  0xd5   : > { %v807_v47 = vadd.f32 %v806_v42, %v800_v39 }
  0xd6   : > { %v399_v14 = vpop.f32.mrf.mxu0  ;;  %v551_v25 = vpop.f32.mrf.mxu2 }
  0xd7   : > { %v469_v24 = vadd.f32 %v468_v12, %v399_v14 }
  0xd8   : > { %v746_v16 = vpop.f32.mrf.mxu3 }
  0xd9   : > { %v762_v19 = vadd.f32 %v746_v16, %v562_v15  ;;  %v563_v27 = vadd.f32 %v549_v17, %v469_v24  ;;  %v473_v30 = vpop.f32.mrf.mxu1 }
  0xdb   : > { %v1170_v20 = vpack.c.bf16 %v762_v19, %v761_v18  ;;  %v801_v46 = vmul.f32 %v762_v19, %v762_v19  ;;  %v789_v50 = vadd.f32 %v788_v45, %v762_v19 }
  0xdd   : > { %1198 = vst [vmem:[%s1628_s5 + $0x8] sm:$0xff] %v1170_v20   ;;  %v808_v54 = vadd.f32 %v807_v47, %v801_v46 }
  0xde   : > { %v401_v22 = vpop.f32.mrf.mxu0  ;;  %v554_v37 = vpop.f32.mrf.mxu2 }
  0xdf   : > { %v471_v26 = vadd.f32 %v470_v21, %v401_v22 }
  0xe0   : > { %v749_v23 = vpop.f32.mrf.mxu3 }
  0xe1   : > { %v564_v29 = vadd.f32 %v551_v25, %v471_v26  ;;  %v763_v32 = vadd.f32 %v749_v23, %v563_v27  ;;  %v475_v48 = vpop.f32.mrf.mxu1 }
  0xe3   : > { %v802_v51 = vmul.f32 %v763_v32, %v763_v32  ;;  %v790_v55 = vadd.f32 %v789_v50, %v763_v32 }
  0xe5   : > { %v809_v58 = vadd.f32 %v808_v54, %v802_v51 }
  0xe6   : > { %v404_v28 = vpop.f32.mrf.mxu0  ;;  %v556_v57 = vpop.f32.mrf.mxu2 }
  0xe7   : > { %v474_v35 = vadd.f32 %v473_v30, %v404_v28 }
  0xe8   : > { %v751_v31 = vpop.f32.mrf.mxu3 }
  0xe9   : > { %v764_v33 = vadd.f32 %v751_v31, %v564_v29  ;;  %v565_v41 = vadd.f32 %v554_v37, %v474_v35 }
  0xeb   : > { %v1175_v34 = vpack.c.bf16 %v764_v33, %v763_v32  ;;  %v803_v56 = vmul.f32 %v764_v33, %v764_v33  ;;  %v791_v59 = vadd.f32 %v790_v55, %v764_v33 }
  0xed   : > { %1199 = vst [vmem:[%s1628_s5 + $0x10] sm:$0xff] %v1175_v34   ;;  %v810_v62 = vadd.f32 %v809_v58, %v803_v56 }
  0xee   : > { %v406_v44 = vpop.f32.mrf.mxu0 }
  0xef   : > { %v476_v53 = vadd.f32 %v475_v48, %v406_v44 }
  0xf0   : > { %v754_v43 = vpop.f32.mrf.mxu3 }
  0xf1   : > { %v765_v52 = vadd.f32 %v754_v43, %v565_v41  ;;  %v566_v61 = vadd.f32 %v556_v57, %v476_v53 }
  0xf3   : > { %v804_v60 = vmul.f32 %v765_v52, %v765_v52  ;;  %v792_v63 = vadd.f32 %v791_v59, %v765_v52 }
  0xf5   : > { %v811_v2 = vadd.f32 %v810_v62, %v804_v60 }
  0xf8   : > { %v756_v49 = vpop.f32.mrf.mxu3 }
  0xf9   : > { %v766_v0 = vadd.f32 %v756_v49, %v566_v61 }
  0xfb   : > { %v1180_v3 = vpack.c.bf16 %v766_v0, %v765_v52  ;;  %v793_v4 = vadd.f32 %v792_v63, %v766_v0  ;;  %v805_v5 = vmul.f32 %v766_v0, %v766_v0 }
  0xfd   : > { %1200 = vst [vmem:[%s1628_s5 + $0x18] sm:$0xff] %v1180_v3   ;;  %v794_v7 = vadd.f32 %v793_v4, %v786_v1  ;;  %v812_v8 = vadd.f32 %v811_v2, %v805_v5 }
  0xff   : > { %795 = vst [vmem:[#allocation3] sm:$0xff] %v794_v7  ;;  %v813_v9 = vadd.f32 %v812_v8, %v797_v6 }
 0x101   : > { %814 = vst [vmem:[#allocation3 + $0x8] sm:$0xff] %v813_v9 }
 0x102 PF: > { %p1138_p1 = scmp.ne.s32.totalorder %s1368_s16, 1 }
 0x103   : > { %p1139_p2 = scmp.ne.s32.totalorder (!%p1138_p1), %s1364_s15, 0 }
 0x104   : > { %818 = sbr.rel (%p1138_p1) target bundleno = 342 (0x156), region = 44 }
 0x109   : > { %822 = sbr.rel (%p1139_p2) target bundleno = 322 (0x142), region = 48 }
 0x10e   : > { %v823_v10 = vld [vmem:[#allocation3] sm:$0xff]  ;;  %v839_v11 = vld [vmem:[#allocation3 + $0x8] sm:$0xff]  ;;  %v1383_v13 = vmov 128.0  }
 0x10f   : > { %v824_v12 = vrot.slane %v823_v10, 4  ;;  %1280 = vrcp.f32 %v1383_v13  ;;  %v840_v14 = vrot.slane %v839_v11, 4  ;;  %v850_v42 = vld [vmem:[%s1699_s2] sm:$0x1]  ;;  %v864_v46 = vld [vmem:[%s1699_s2 + $0x1] sm:$0x1] }
 0x111   : > { %v825_v15 = vadd.f32 %v824_v12, %v823_v10  ;;  %v841_v16 = vadd.f32 %v840_v14, %v839_v11 }
 0x113   : > { %v826_v17 = vrot.slane %v825_v15, 2  ;;  %v842_v18 = vrot.slane %v841_v16, 2 }
 0x115   : > { %v1281_v19 = vpop.eup %1280  ;;  %v827_v20 = vadd.f32 %v826_v17, %v825_v15  ;;  %v843_v21 = vadd.f32 %v842_v18, %v841_v16 }
 0x116   : > { %v831_v22 = vmul.f32 128.0, %v1281_v19  ;;  %vm835_vm5 = vweird.f32 %v1281_v19 }
 0x117   : > { %v828_v23 = vrot.slane %v827_v20, 1  ;;  %v844_v24 = vrot.slane %v843_v21, 1 }
 0x118   : > { %v832_v25 = vsub.f32 1.0, %v831_v22 }
 0x119   : > { %v829_v27 = vadd.f32 %v828_v23, %v827_v20  ;;  %v845_v28 = vadd.f32 %v844_v24, %v843_v21 }
 0x11a   : > { %v833_v26 = vmul.f32 %v1281_v19, %v832_v25 }
 0x11c   : > { %v834_v29 = vadd.f32 %v1281_v19, %v833_v26 }
 0x11e   : > { %v836_v30 = vsel %vm835_vm5, %v1281_v19, %v834_v29 }
 0x11f   : > { %v837_v31 = vmul.f32 %v836_v30, %v829_v27  ;;  %v846_v32 = vmul.f32 %v845_v28, %v836_v30 }
 0x121   : > { %v847_v33 = vmul.f32 %v837_v31, %v837_v31 }
 0x123   : > { %v848_v34 = vsub.f32 %v846_v32, %v847_v33 }
 0x125   : > { %v849_v35 = vmax.f32 %v848_v34, 0.0 }
 0x127   : > { %v851_v36 = vadd.f32 1e-05, %v849_v35 }
 0x129   : > { %1282 = vrsqrt.f32 %v851_v36  ;;  %vm858_vm6 = vweird.f32 %v851_v36 }
 0x12f   : > { %v1283_v37 = vpop.eup %1282 }
 0x130   : > { %v853_v38 = vmul.f32 %v1283_v37, %v851_v36  ;;  %vm859_vm7 = vweird.f32 %v1283_v37 }
 0x131   : > { %vm860_vm8 = vmor %vm858_vm6, %vm859_vm7 }
 0x132   : > { %v854_v39 = vmul.f32 %v1283_v37, %v853_v38 }
 0x134   : > { %v855_v40 = vmul.f32 0.5, %v854_v39 }
 0x136   : > { %v856_v41 = vsub.f32 1.5, %v855_v40 }
 0x138   : > { %v857_v43 = vmul.f32 %v1283_v37, %v856_v41 }
 0x13a   : > { %v861_v44 = vsel %vm860_vm8, %v1283_v37, %v857_v43 }
 0x13b   : > { %v862_v45 = vmul.f32 %v861_v44, %v850_v42 }
 0x13d   : > { %863 = vst [vmem:[#allocation4] sm:$0x1] %v862_v45  ;;  %v865_v47 = vmul.f32 %v862_v45, %v837_v31 }
 0x13f   : > { %v866_v48 = vsub.f32 %v864_v46, %v865_v47 }
 0x141   : > { %867 = vst [vmem:[#allocation4 + $0x1] sm:$0x1] %v866_v48 }
 0x142 PF: > { %s1160_s10 = sshll.u32 %s1364_s15, 5 }
 0x143   : > { %s870_s21 = scalar_lea.vmem [#allocation2], %s1160_s10 }
 0x144   : > { %v1284_v50 = vld [vmem:[#allocation4] ss:$0 sm:$0xff]  ;;  %v1183_v51 = vld [vmem:[%s870_s21] sm:$0xff]   ;;  %v1201_v52 = vld [vmem:[%s870_s21 + $0x8] sm:$0xff]  }
 0x145   : > { %v1202_v53 = vld [vmem:[%s870_s21 + $0x10] sm:$0xff]   ;;  %v1184_v54 = vunpack.c.l.bf16 %v1183_v51  ;;  %v1185_v56 = vunpack.c.h.bf16 %v1183_v51  ;;  %v1188_v57 = vunpack.c.l.bf16 %v1201_v52  ;;  %v1189_v58 = vunpack.c.h.bf16 %v1201_v52  ;;  %v1203_v59 = vld [vmem:[%s870_s21 + $0x18] sm:$0xff]  }
 0x146   : > { %v1192_v60 = vunpack.c.l.bf16 %v1202_v53  ;;  %v1193_v61 = vunpack.c.h.bf16 %v1202_v53  ;;  %v1196_v49 = vunpack.c.l.bf16 %v1203_v59  ;;  %v1197_v62 = vunpack.c.h.bf16 %v1203_v59 }
 0x147   : > { %v889_v63 = vmul.f32 %v1284_v50, %v1184_v54  ;;  %v890_v0 = vmul.f32 %v1284_v50, %v1185_v56  ;;  %v891_v1 = vmul.f32 %v1284_v50, %v1188_v57  ;;  %v892_v2 = vmul.f32 %v1284_v50, %v1189_v58 }
 0x148   : > { %v1285_v55 = vld [vmem:[#allocation4 + $0x1] ss:$0 sm:$0xff]  ;;  %v893_v3 = vmul.f32 %v1284_v50, %v1192_v60  ;;  %v894_v4 = vmul.f32 %v1284_v50, %v1193_v61  ;;  %v895_v5 = vmul.f32 %v1284_v50, %v1196_v49  ;;  %v896_v6 = vmul.f32 %v1284_v50, %v1197_v62 }
 0x149   : > { %v899_v7 = vadd.f32 %v1285_v55, %v889_v63  ;;  %v900_v8 = vadd.f32 %v1285_v55, %v890_v0  ;;  %v901_v9 = vadd.f32 %v1285_v55, %v891_v1  ;;  %v902_v10 = vadd.f32 %v1285_v55, %v892_v2 }
 0x14a   : > { %v903_v11 = vadd.f32 %v1285_v55, %v893_v3  ;;  %v904_v12 = vadd.f32 %v1285_v55, %v894_v4  ;;  %v905_v13 = vadd.f32 %v1285_v55, %v895_v5  ;;  %v906_v14 = vadd.f32 %v1285_v55, %v896_v6 }
 0x14b   : > { %vm907_vm9 = vcmp.ge.f32.partialorder %v899_v7, 0.0  ;;  %v915_v15 = vmul.f32 0.2, %v899_v7  ;;  %vm908_vm10 = vcmp.ge.f32.partialorder %v900_v8, 0.0  ;;  %v916_v16 = vmul.f32 0.2, %v900_v8 }
 0x14c   : > { %vm909_vm11 = vcmp.ge.f32.partialorder %v901_v9, 0.0  ;;  %v917_v17 = vmul.f32 0.2, %v901_v9  ;;  %vm910_vm12 = vcmp.ge.f32.partialorder %v902_v10, 0.0  ;;  %v918_v18 = vmul.f32 0.2, %v902_v10 }
 0x14d   : > { %v923_v19 = vsel %vm907_vm9, %v899_v7, %v915_v15  ;;  %v924_v20 = vsel %vm908_vm10, %v900_v8, %v916_v16  ;;  %vm911_vm13 = vcmp.ge.f32.partialorder %v903_v11, 0.0  ;;  %v919_v21 = vmul.f32 0.2, %v903_v11 }
 0x14e   : > { %931 = vst [vmem:[%s1487_s20] sm:$0xff] %v923_v19  ;;  %v925_v22 = vsel %vm909_vm11, %v901_v9, %v917_v17  ;;  %v926_v23 = vsel %vm910_vm12, %v902_v10, %v918_v18  ;;  %vm912_vm14 = vcmp.ge.f32.partialorder %v904_v12, 0.0  ;;  %v920_v24 = vmul.f32 0.2, %v904_v12 }
 0x14f   : > { %932 = vst [vmem:[%s1487_s20 + $0x8] sm:$0xff] %v924_v20  ;;  %v927_v25 = vsel %vm911_vm13, %v903_v11, %v919_v21  ;;  %vm913_vm15 = vcmp.ge.f32.partialorder %v905_v13, 0.0  ;;  %v921_v26 = vmul.f32 0.2, %v905_v13  ;;  %vm914_vm0 = vcmp.ge.f32.partialorder %v906_v14, 0.0 }
 0x150   : > { %933 = vst [vmem:[%s1487_s20 + $0x10] sm:$0xff] %v925_v22  ;;  %v928_v27 = vsel %vm912_vm14, %v904_v12, %v920_v24  ;;  %v922_v28 = vmul.f32 0.2, %v906_v14 }
 0x151   : > { %934 = vst [vmem:[%s1487_s20 + $0x18] sm:$0xff] %v926_v23  ;;  %v929_v29 = vsel %vm913_vm15, %v905_v13, %v921_v26 }
 0x152   : > { %935 = vst [vmem:[%s1487_s20 + $0x20] sm:$0xff] %v927_v25  ;;  %v930_v30 = vsel %vm914_vm0, %v906_v14, %v922_v28 }
 0x153   : > { %936 = vst [vmem:[%s1487_s20 + $0x28] sm:$0xff] %v928_v27 }
 0x154   : > { %937 = vst [vmem:[%s1487_s20 + $0x30] sm:$0xff] %v929_v29 }
 0x155   : > { %938 = vst [vmem:[%s1487_s20 + $0x38] sm:$0xff] %v930_v30 }
 0x156 PF: > { %s947_s24 = smul.u32 %s1364_s15, %s1368_s16  ;;  %s953_s27 = sshll.u32 %s1487_s20, 4  ;;  %s954_s27 = int_to_ptr.vmem [resolvable:$true] %s953_s27 }
 0x157   : > { %s940_s7 = scalar_lea.sflag [#allocation6], %s185_s4  ;;  %s1306_s16 = scalar_lea.hbm %s1700_s3, 128 }
 0x158   : > { %s1161_s28 = sshll.u32 %s947_s24, 6 }
 0x159   : > { %s952_s5 = scalar_lea.hbm %s1700_s3, %s1161_s28 }
 0x15a   : > { %s955_s6 = sshll.u32 %s952_s5, 4  ;;  %s956_s6 = int_to_ptr.hbm [resolvable:$true] %s955_s6 }
 0x15b   : > { %s1300_s8 = sshra.s32 %s956_s6, 4  ;;  %s1301_s8 = int_to_ptr.hbm [resolvable:$true] %s1300_s8 }
 0x15c   : > { %s1302_s9 = scalar_lea.hbm %s1301_s8, 64  ;;  %p1307_p7 = scmp.lt.s32.totalorder %s1301_s8, %s1700_s3 }
 0x15d   : > { %p1303_p3 = scmp.ne.s32.totalorder %s1301_s8, %s1302_s9  ;;  %p1308_p9 = scmp.lt.s32.totalorder %s1306_s16, %s1302_s9 }
 0x15f   : > { %p1304_p4 = pnand %p1303_p3, %p1459_p6  ;;  %p1309_p10 = por %p1308_p9, %p1307_p7 }
 0x161   : > { %p1305_p5 = pneg %p1304_p4 }
 0x163   : > { %p1310_p11 = pnand %p1309_p10, %p1305_p5 }
 0x165   : > { %1313 = shalt.err (!%p1310_p11)
}
 0x166   : > { %s1384_s4 = smov 128   ;;  %s1385_s24 = smov 8  }
 0x167   : > { %1205 = dma.vmem_to_hbm [thread:$0]  (%p1459_p6), %s954_s27, 1024, %s956_s6, %s940_s7, %s1384_s4, %s1384_s4, %s1385_s24  }
 0x168 PF: > { %p1211_p12 = scmp.ge.s32.totalorder %s1380_s19, 2  ;;  %s970_s28 = sand.u32 1, %s1352_s12  }
 0x169   : > { %s971_s29 = scalar_lea.sflag [#allocation6], %s970_s28 }
 0x16a   : > { %p1208_p13 = pnand %p1211_p12, %p1466_p8 }
 0x16c   : > { %p1209_p0 = pneg %p1208_p13 }
 0x16e   : > { %1347 = dma.done.wait (%p1209_p0), %s971_s29, 1024  }
 0x16f   : > { %1349 = vsyncadd (%p1209_p0), %s971_s29, 4294966272  ;;  %s16_s19 = sadd.s32 1, %s1380_s19   ;;  %s1705_s12 = smov %s1356_s13 }
 0x170   : > { %p13_p1 = scmp.ge.s32.totalorder %s16_s19, 6   ;;  %s1706_s13 = smov %s1360_s14 }
 0x171   : > { %s1707_s14 = smov %s1475_s30  ;;  %s1708_s15 = smov %s1372_s17 }
 0x172   : > { %s1709_s16 = smov %s1376_s18  ;;  %s1710_s17 = smov %s1713_s22 }
 0x173   : > { %s1711_s18 = smov %s1717_s23  ;;  %15 = sbr.rel (!%p13_p1) target bundleno = 5 (0x5), region = 91 }
 0x178   :  { %977 = vsyncpa [#allocation6], 1 }
 0x179   :  { %979 = vsyncpa [#allocation6 + $0x1], 1 }

// kernel: tpu_custom_call.1
= control target key start
LH: loop header
LB: loop body
LE: loop exit
PB: predicated region body
PF: predicated region fallthrough
CT: control target
= control target key end

     0   :  { %10 = vsyncpa [#allocation3], 0  ;;  %s710_s0 = inlined_call_operand.hbm [shape: bf16[128,128], index: 0, kind: input, shape index: {}]   ;;  %s711_s1 = inlined_call_operand.hbm [shape: bf16[128,128], index: 1, kind: input, shape index: {}]   ;;  %s712_s2 = inlined_call_operand.hbm [shape: bf16[128,128], index: 2, kind: output, shape index: {0}]   ;;  %s713_s3 = inlined_call_operand.hbm [shape: f32[1,8,128], index: 3, kind: output, shape index: {1}]   ;;  %s714_s4 = inlined_call_operand.hbm [shape: f32[1,8,128], index: 4, kind: output, shape index: {2}]  }
   0x1   :  { %11 = vsyncpa [#allocation6], 0 }
   0x2   :  { %12 = vsyncpa [#allocation4], 0 }
   0x3   :  { %13 = vsyncpa [#allocation9], 0  ;;  %s18_s17 = sshll.u32 %s710_s0, 4  ;;  %s642_s18 = smov [#allocation2]   ;;  %s19_s17 = int_to_ptr.hbm [resolvable:$true] %s18_s17 }
   0x4   :  { %s20_s19 = sshll.u32 %s642_s18, 4  ;;  %s31_s22 = sshll.u32 %s711_s1, 4  ;;  %s21_s19 = int_to_ptr.vmem [resolvable:$true] %s20_s19  ;;  %s32_s22 = int_to_ptr.hbm [resolvable:$true] %s31_s22 }
   0x5   :  { %s643_s23 = smov 64   ;;  %s644_s24 = smov 4  }
   0x6   :  { %26 = dma.hbm_to_vmem [thread:$0]  %s19_s17, 1024, %s21_s19, [#allocation3], %s643_s23, %s643_s23, %s644_s24  }
   0x7   :  { %s645_s25 = smov [#allocation5]  }
   0x8   :  { %s33_s26 = sshll.u32 %s645_s25, 4  ;;  %s34_s26 = int_to_ptr.vmem [resolvable:$true] %s33_s26 }
   0x9   :  { %39 = dma.hbm_to_vmem [thread:$0]  %s32_s22, 1024, %s34_s26, [#allocation6], %s643_s23, %s643_s23, %s644_s24  }
   0xa   :  { %634 = dma.done.wait [#allocation3], 1024  }
   0xb   :  { %635 = vsyncadd [#allocation3], 4294966272 }
   0xc   :  { %636 = dma.done.wait [#allocation6], 1024  }
   0xd   :  { %637 = vsyncadd [#allocation6], 4294966272  ;;  %v435_v0 = vld [vmem:[#allocation5 + $0x38] sm:$0xff]  ;;  %v434_v1 = vld [vmem:[#allocation5 + $0x30] sm:$0xff]  ;;  %s646_s0 = smov [#allocation7]   ;;  %s311_s29 = sshll.u32 %s712_s2, 4  ;;  %s312_s29 = int_to_ptr.hbm [resolvable:$true] %s311_s29 }
   0xe   :  { %176 = vmatpush.bf16.msra.mxu0 %v435_v0  ;;  %483 = vmatpush.bf16.msra.mxu1 %v435_v0  ;;  %v433_v2 = vld [vmem:[#allocation5 + $0x28] sm:$0xff]  ;;  %v432_v3 = vld [vmem:[#allocation5 + $0x20] sm:$0xff]  ;;  %v431_v4 = vld [vmem:[#allocation5 + $0x18] sm:$0xff]  ;;  %s309_s1 = sshll.u32 %s646_s0, 4  ;;  %s647_s2 = smov [#allocation8]   ;;  %s310_s1 = int_to_ptr.vmem [resolvable:$true] %s309_s1 }
   0xf   :  { %484 = vmatpush.bf16.msra.mxu2 %v435_v0  ;;  %485 = vmatpush.bf16.msra.mxu3 %v435_v0  ;;  %v430_v5 = vld [vmem:[#allocation5 + $0x10] sm:$0xff]  ;;  %v429_v6 = vld [vmem:[#allocation5 + $0x8] sm:$0xff]  ;;  %v428_v7 = vld [vmem:[#allocation5] sm:$0xff]  ;;  %s323_s30 = sshll.u32 %s647_s2, 4  ;;  %s325_s7 = sshll.u32 %s713_s3, 4  ;;  %s324_s30 = int_to_ptr.vmem [resolvable:$true] %s323_s30  ;;  %s326_s7 = int_to_ptr.hbm [resolvable:$true] %s325_s7 }
  0x10   :  { %v420_v8 = vld [vmem:[#allocation2] sm:$0xff]  ;;  %v422_v9 = vld [vmem:[#allocation2 + $0x10] sm:$0xff]  ;;  %v421_v12 = vld [vmem:[#allocation2 + $0x8] sm:$0xff]  ;;  %s648_s8 = smov [#allocation10]   ;;  %s336_s12 = sshll.u32 %s714_s4, 4  ;;  %s337_s12 = int_to_ptr.hbm [resolvable:$true] %s336_s12 }
  0x11   :  { %v424_v10 = vld [vmem:[#allocation2 + $0x20] sm:$0xff]  ;;  %v426_v11 = vld [vmem:[#allocation2 + $0x30] sm:$0xff]  ;;  %v423_v13 = vld [vmem:[#allocation2 + $0x18] sm:$0xff]  ;;  %s334_s9 = sshll.u32 %s648_s8, 4  ;;  %s335_s9 = int_to_ptr.vmem [resolvable:$true] %s334_s9 }
  0x12   :  { %177 = vmatpush.bf16.msra.mxu0 %v434_v1  ;;  %486 = vmatpush.bf16.msra.mxu1 %v434_v1  ;;  %v425_v14 = vld [vmem:[#allocation2 + $0x28] sm:$0xff]  ;;  %v427_v15 = vld [vmem:[#allocation2 + $0x38] sm:$0xff] }
  0x13   :  { %487 = vmatpush.bf16.msra.mxu2 %v434_v1  ;;  %488 = vmatpush.bf16.msra.mxu3 %v434_v1 }
  0x16   :  { %178 = vmatpush.bf16.msra.mxu0 %v433_v2  ;;  %489 = vmatpush.bf16.msra.mxu1 %v433_v2 }
  0x17   :  { %490 = vmatpush.bf16.msra.mxu2 %v433_v2  ;;  %491 = vmatpush.bf16.msra.mxu3 %v433_v2 }
  0x1a   :  { %179 = vmatpush.bf16.msra.mxu0 %v432_v3  ;;  %492 = vmatpush.bf16.msra.mxu1 %v432_v3 }
  0x1b   :  { %493 = vmatpush.bf16.msra.mxu2 %v432_v3  ;;  %494 = vmatpush.bf16.msra.mxu3 %v432_v3 }
  0x1e   :  { %180 = vmatpush.bf16.msra.mxu0 %v431_v4  ;;  %495 = vmatpush.bf16.msra.mxu1 %v431_v4 }
  0x1f   :  { %496 = vmatpush.bf16.msra.mxu2 %v431_v4  ;;  %497 = vmatpush.bf16.msra.mxu3 %v431_v4 }
  0x22   :  { %181 = vmatpush.bf16.msra.mxu0 %v430_v5  ;;  %498 = vmatpush.bf16.msra.mxu1 %v430_v5 }
  0x23   :  { %499 = vmatpush.bf16.msra.mxu2 %v430_v5  ;;  %500 = vmatpush.bf16.msra.mxu3 %v430_v5 }
  0x26   :  { %182 = vmatpush.bf16.msra.mxu0 %v429_v6  ;;  %501 = vmatpush.bf16.msra.mxu1 %v429_v6 }
  0x27   :  { %502 = vmatpush.bf16.msra.mxu2 %v429_v6  ;;  %503 = vmatpush.bf16.msra.mxu3 %v429_v6 }
  0x2a   :  { %183 = vmatpush.bf16.msra.mxu0 %v428_v7  ;;  %504 = vmatpush.bf16.msra.mxu1 %v428_v7 }
  0x2b   :  { %505 = vmatpush.bf16.msra.mxu2 %v428_v7  ;;  %506 = vmatpush.bf16.msra.mxu3 %v428_v7 }
  0x2d   :  { %184 = vmatmul.bf16.vlgmr.msra.gmra.mxu0 %v420_v8  ;;  %194 = vmatmul.bf16.vlgmr.msra.gmra.mxu1 %v422_v9 }
  0x2e   :  { %204 = vmatmul.bf16.vlgmr.msra.gmra.mxu2 %v424_v10  ;;  %214 = vmatmul.bf16.vlgmr.msra.gmra.mxu3 %v426_v11 }
  0x3d   :  { %189 = vmatmul.bf16.gmra.mxu0 %v421_v12  ;;  %199 = vmatmul.bf16.gmra.mxu1 %v423_v13 }
  0x3e   :  { %209 = vmatmul.bf16.gmra.mxu2 %v425_v14  ;;  %219 = vmatmul.bf16.gmra.mxu3 %v427_v15 }
  0xaa   :  { %v185_v16 = vpop.f32.mrf.mxu0  ;;  %v195_v17 = vpop.f32.mrf.mxu1 }
  0xab   :  { %v273_v31 = vmul.f32 %v185_v16, %v185_v16  ;;  %v277_v45 = vmul.f32 %v195_v17, %v195_v17 }
  0xb1   :  { %v205_v18 = vpop.f32.mrf.mxu2  ;;  %v686_v19 = vpop.f32.mrf.mxu3 }
  0xb2   :  { %v187_v20 = vpop.f32.mrf.mxu0  ;;  %v197_v21 = vpop.f32.mrf.mxu1  ;;  %v281_v61 = vmul.f32 %v205_v18, %v205_v18  ;;  %v285_v9 = vmul.f32 %v686_v19, %v686_v19 }
  0xb3   :  { %v439_v22 = vpack.c.bf16 %v187_v20, %v185_v16  ;;  %v449_v23 = vpack.c.bf16 %v197_v21, %v195_v17  ;;  %v274_v30 = vmul.f32 %v187_v20, %v187_v20  ;;  %v257_v33 = vadd.f32 %v187_v20, %v185_v16 }
  0xb4   :  { %v278_v48 = vmul.f32 %v197_v21, %v197_v21 }
  0xb5   :  { %440 = vst [vmem:[#allocation7] sm:$0xff] %v439_v22   ;;  %v289_v34 = vadd.f32 %v274_v30, %v273_v31 }
  0xb6   :  { %477 = vst [vmem:[#allocation7 + $0x10] sm:$0xff] %v449_v23  }
  0xb9   :  { %v207_v24 = vpop.f32.mrf.mxu2  ;;  %v688_v25 = vpop.f32.mrf.mxu3 }
  0xba   :  { %v190_v26 = vpop.f32.mrf.mxu0  ;;  %v200_v27 = vpop.f32.mrf.mxu1  ;;  %v459_v28 = vpack.c.bf16 %v207_v24, %v205_v18  ;;  %v469_v29 = vpack.c.bf16 %v688_v25, %v686_v19  ;;  %v282_v0 = vmul.f32 %v207_v24, %v207_v24  ;;  %v286_v12 = vmul.f32 %v688_v25, %v688_v25 }
  0xbb   :  { %v275_v32 = vmul.f32 %v190_v26, %v190_v26  ;;  %v258_v35 = vadd.f32 %v257_v33, %v190_v26  ;;  %v279_v51 = vmul.f32 %v200_v27, %v200_v27 }
  0xbc   :  { %479 = vst [vmem:[#allocation7 + $0x20] sm:$0xff] %v459_v28  }
  0xbd   :  { %481 = vst [vmem:[#allocation7 + $0x30] sm:$0xff] %v469_v29   ;;  %v290_v38 = vadd.f32 %v289_v34, %v275_v32 }
  0xc1   :  { %v210_v36 = vpop.f32.mrf.mxu2  ;;  %v220_v37 = vpop.f32.mrf.mxu3 }
  0xc2   :  { %v192_v39 = vpop.f32.mrf.mxu0  ;;  %v202_v40 = vpop.f32.mrf.mxu1  ;;  %v283_v4 = vmul.f32 %v210_v36, %v210_v36  ;;  %v287_v16 = vmul.f32 %v220_v37, %v220_v37 }
  0xc3   :  { %v444_v41 = vpack.c.bf16 %v192_v39, %v190_v26  ;;  %v259_v42 = vadd.f32 %v258_v35, %v192_v39  ;;  %v276_v43 = vmul.f32 %v192_v39, %v192_v39  ;;  %v454_v44 = vpack.c.bf16 %v202_v40, %v200_v27 }
  0xc4   :  { %v280_v59 = vmul.f32 %v202_v40, %v202_v40 }
  0xc5   :  { %476 = vst [vmem:[#allocation7 + $0x8] sm:$0xff] %v444_v41   ;;  %v260_v46 = vadd.f32 %v259_v42, %v195_v17  ;;  %v291_v47 = vadd.f32 %v290_v38, %v276_v43 }
  0xc6   :  { %478 = vst [vmem:[#allocation7 + $0x18] sm:$0xff] %v454_v44  }
  0xc7   :  { %v292_v49 = vadd.f32 %v291_v47, %v277_v45  ;;  %v261_v50 = vadd.f32 %v260_v46, %v197_v21 }
  0xc9   :  { %v262_v52 = vadd.f32 %v261_v50, %v200_v27  ;;  %v293_v53 = vadd.f32 %v292_v49, %v278_v48  ;;  %v212_v54 = vpop.f32.mrf.mxu2  ;;  %v222_v55 = vpop.f32.mrf.mxu3 }
  0xca   :  { %v464_v56 = vpack.c.bf16 %v212_v54, %v210_v36  ;;  %v474_v57 = vpack.c.bf16 %v222_v55, %v220_v37  ;;  %v284_v8 = vmul.f32 %v212_v54, %v212_v54  ;;  %v288_v20 = vmul.f32 %v222_v55, %v222_v55 }
  0xcb   :  { %v263_v58 = vadd.f32 %v262_v52, %v202_v40  ;;  %v294_v60 = vadd.f32 %v293_v53, %v279_v51 }
  0xcc   :  { %480 = vst [vmem:[#allocation7 + $0x28] sm:$0xff] %v464_v56  }
  0xcd   :  { %v264_v62 = vadd.f32 %v263_v58, %v205_v18  ;;  %v295_v63 = vadd.f32 %v294_v60, %v280_v59  ;;  %482 = vst [vmem:[#allocation7 + $0x38] sm:$0xff] %v474_v57  }
  0xce   :  { %317 = dma.vmem_to_hbm [thread:$0]  %s310_s1, 1024, %s312_s29, [#allocation4], %s643_s23, %s643_s23, %s644_s24  }
  0xcf   :  { %v296_v1 = vadd.f32 %v295_v63, %v281_v61  ;;  %v265_v2 = vadd.f32 %v264_v62, %v207_v24 }
  0xd1   :  { %v266_v3 = vadd.f32 %v265_v2, %v210_v36  ;;  %v297_v5 = vadd.f32 %v296_v1, %v282_v0 }
  0xd3   :  { %v298_v6 = vadd.f32 %v297_v5, %v283_v4  ;;  %v267_v7 = vadd.f32 %v266_v3, %v212_v54 }
  0xd5   :  { %v268_v10 = vadd.f32 %v267_v7, %v686_v19  ;;  %v299_v11 = vadd.f32 %v298_v6, %v284_v8 }
  0xd7   :  { %v300_v13 = vadd.f32 %v299_v11, %v285_v9  ;;  %v269_v14 = vadd.f32 %v268_v10, %v688_v25 }
  0xd9   :  { %v270_v15 = vadd.f32 %v269_v14, %v220_v37  ;;  %v301_v17 = vadd.f32 %v300_v13, %v286_v12 }
  0xdb   :  { %v302_v18 = vadd.f32 %v301_v17, %v287_v16  ;;  %v271_v19 = vadd.f32 %v270_v15, %v222_v55 }
  0xdd   :  { %v303_v21 = vadd.f32 %v302_v18, %v288_v20  ;;  %272 = vst [vmem:[#allocation8] sm:$0xff] %v271_v19 }
  0xde   :  { %328 = dma.vmem_to_hbm [thread:$0]  %s324_s30, 128, %s326_s7, [#allocation9]  }
  0xdf   :  { %304 = vst [vmem:[#allocation10] sm:$0xff] %v303_v21 }
  0xe0   :  { %339 = dma.vmem_to_hbm [thread:$0]  %s335_s9, 128, %s337_s12, [#allocation9]  }
  0xe1   :  { %638 = dma.done.wait [#allocation4], 1024  }
  0xe2   :  { %639 = vsyncadd [#allocation4], 4294966272 }
  0xe3   :  { %640 = dma.done.wait [#allocation9], 256  }
  0xe4   :  { %641 = vsyncadd [#allocation9], 4294967040 }
  0xe5   :  { %352 = vsyncpa [#allocation3], 1 }
  0xe6   :  { %353 = vsyncpa [#allocation6], 1 }
  0xe7   :  { %354 = vsyncpa [#allocation4], 1 }
  0xe8   :  { %355 = vsyncpa [#allocation9], 1 }

</bundles_post_ra>
